<compile_context>
chip_gen: v7x
topology: tpu7x:2x2x1
jax: 0.10.0
libtpu: 0.0.40
codegen_flags: <defaults>
</compile_context>

<pallas_src>
import jax
import jax.numpy as jnp
import numpy as np
from jax.experimental import pallas as pl
from jax.experimental.pallas import tpu as pltpu

# ----------------------- hyperparameters (static) ---------------------------
X_SIZE = 4
Y_SIZE = 1
Y_FEAT_SIZE = X_SIZE - Y_SIZE     # 3
X_HORIZON = 8
Y_HORIZON = 6
H1, H2 = 32, 16                   # hidden_size = [32, 16]
BATCH = 8
LN_EPS = 1e-5
G = 3 * H1                        # 96 (r,z,n gate pre-activations)


# ------------------------------- kernel -------------------------------------
def occ_gru_kernel(x_ref, yf_ref,
                   wih_ref, wihy_ref, wihf_ref, bih_ref,
                   wcat_ref, bcat_ref,
                   lng_ref, lnb_ref,
                   w2row_ref, b2_ref,
                   out_ref):
    """Whole forward (GRU encoder + autoregressive decoder) in VMEM.

    x_ref  : (X_HORIZON*B, X_SIZE)   time-major flattened encoder input
    yf_ref : (Y_HORIZON*B, Y_FEAT)   time-major flattened decoder features
    wih    : (X_SIZE, 3H)            input->gates (PyTorch W_ih transposed)
    wihy   : (1, 3H)                 row of W_ih for the fed-back y_t feature
    wihf   : (Y_FEAT, 3H)            rows of W_ih for y_features
    wcat   : (H1, 3H + H2)           [W_hh | W_1]   (fused recurrent + fc input layer)
    bcat   : (1, 3H + H2)            [b_hh | b_1]
    """
    # ---- hoisted weight loads and bias/scale broadcasts (once) -------------
    wih = wih_ref[...]
    wihf = wihf_ref[...]
    wcat = wcat_ref[...]
    wihy_b = jnp.broadcast_to(wihy_ref[...], (BATCH, G))
    bcat_b = jnp.broadcast_to(bcat_ref[...], (BATCH, G + H2))
    lng_b = jnp.broadcast_to(lng_ref[...], (BATCH, H2))
    lnb_b = jnp.broadcast_to(lnb_ref[...], (BATCH, H2))
    w2r_b = jnp.broadcast_to(w2row_ref[...], (BATCH, H2))
    b2_b = jnp.broadcast_to(b2_ref[...], (BATCH, Y_SIZE))

    # ---- input-side gate pre-activations: OFF the recurrence ---------------
    # (one matmul for all 8 encoder steps, one for all 6 decoder steps; b_ih folded in)
    bih_x = jnp.broadcast_to(bih_ref[...], (X_HORIZON * BATCH, G))
    x_gx = jnp.dot(x_ref[...], wih, preferred_element_type=jnp.float32) + bih_x
    bih_y = jnp.broadcast_to(bih_ref[...], (Y_HORIZON * BATCH, G))
    yf_gx = jnp.dot(yf_ref[...], wihf, preferred_element_type=jnp.float32) + bih_y

    def gru_combine(gx, gh, h):
        # PyTorch gate order r, z, n; gx already holds b_ih, gh already holds b_hh
        r = jax.nn.sigmoid(gx[:, 0:H1] + gh[:, 0:H1])
        zg = jax.nn.sigmoid(gx[:, H1:2 * H1] + gh[:, H1:2 * H1])
        n = jnp.tanh(gx[:, 2 * H1:3 * H1] + r * gh[:, 2 * H1:3 * H1])
        return (1.0 - zg) * n + zg * h

    def h_proj(h):
        # ONE MXU op per step: [h @ W_hh + b_hh | h @ W_1 + b_1]  -> (B, 3H + H2)
        return jnp.dot(h, wcat, preferred_element_type=jnp.float32) + bcat_b

    def fc_rest(a):
        # a = h @ W_1 + b_1 (already computed in h_proj); LayerNorm -> ReLU ->
        # (H2 -> 1) as VPU multiply + lane reduce -> ReLU (occcount=True)
        mu = jnp.mean(a, axis=-1, keepdims=True)
        var = jnp.mean((a - mu) ** 2, axis=-1, keepdims=True)
        an = (a - mu) * jax.lax.rsqrt(var + LN_EPS) * lng_b + lnb_b
        an = jnp.maximum(an, 0.0)
        y = jnp.sum(an * w2r_b, axis=-1, keepdims=True) + b2_b
        return jnp.maximum(y, 0.0)

    # ---------------------------- encoder ------------------------------------
    h = jnp.zeros((BATCH, H1), jnp.float32)
    for t in range(X_HORIZON):                       # static unrolled loop
        if t == 0:
            gh = bcat_b[:, 0:G]                      # h == 0  =>  h @ W_hh == 0
        else:
            gh = h_proj(h)[:, 0:G]
        h = gru_combine(x_gx[t * BATCH:(t + 1) * BATCH, :], gh, h)

    # fused projection of the encoder-final h: gh for decoder step 0 + fc input
    z = h_proj(h)
    gh_next = z[:, 0:G]
    y_t = fc_rest(z[:, G:G + H2])                    # (B, y_size)

    # ---------------------------- decoder ------------------------------------
    for i in range(Y_HORIZON):                       # static unrolled loop
        # gx = [y_t, y_feat_i] @ W_ih + b_ih, with the y_t part as a VPU
        # broadcast-multiply and the y_feat part precomputed above.
        gx = yf_gx[i * BATCH:(i + 1) * BATCH, :] + y_t * wihy_b
        h = gru_combine(gx, gh_next, h)
        z = h_proj(h)
        gh_next = z[:, 0:G]                          # unused on the last step; harmless
        y_t = fc_rest(z[:, G:G + H2])
        out_ref[:, i:i + 1] = y_t                    # per-step store, no final concat


# ------------------------------- wrapper -------------------------------------
@jax.jit
def simple_occ_gru_forward(x, y_features, params):
    """x: (B, x_horizon, x_size), y_features: (B, y_horizon, y_feat) — PyTorch
    batch_first layout. Returns (B, y_horizon)."""
    B = x.shape[0]
    # time-major flatten so rows [t*B:(t+1)*B] are step t
    x_flat = jnp.transpose(x, (1, 0, 2)).reshape(X_HORIZON * B, X_SIZE).astype(jnp.float32)
    yf_flat = jnp.transpose(y_features, (1, 0, 2)).reshape(Y_HORIZON * B, Y_FEAT_SIZE).astype(jnp.float32)

    wih_t = params['wih_t']                                   # (x_size, 3H)
    wihy = wih_t[0:1, :]                                      # (1, 3H)    fed-back y_t row
    wihf = wih_t[1:, :]                                       # (y_feat, 3H)
    wcat = jnp.concatenate([params['whh_t'], params['w1_t']], axis=1)   # (H1, 3H+H2)
    bcat = jnp.concatenate([params['bhh'], params['b1']], axis=1)       # (1, 3H+H2)
    w2row = params['w2_t'].T                                  # (1, H2)

    ins = (x_flat, yf_flat,
           wih_t, wihy, wihf, params['bih'],
           wcat, bcat,
           params['ln_g'], params['ln_b'],
           w2row, params['b2'])
    return pl.pallas_call(
        occ_gru_kernel,
        out_shape=jax.ShapeDtypeStruct((B, Y_HORIZON), jnp.float32),
        in_specs=[pl.BlockSpec(memory_space=pltpu.MemorySpace.VMEM)] * len(ins),
        out_specs=pl.BlockSpec(memory_space=pltpu.MemorySpace.VMEM),
    )(*ins)


# --------------------------- parameter init ----------------------------------
def init_params(key):
    ks = jax.random.split(key, 8)
    k_gru = 1.0 / np.sqrt(H1)
    k_l1 = 1.0 / np.sqrt(H1)
    k_l2 = 1.0 / np.sqrt(H2)

    def u(k, shape, bound):
        return jax.random.uniform(k, shape, jnp.float32, -bound, bound)

    # PyTorch layouts: weight_ih (3H, in), weight_hh (3H, H), Linear weight (out, in)
    wih = u(ks[0], (3 * H1, X_SIZE), k_gru)
    whh = u(ks[1], (3 * H1, H1), k_gru)
    bih = u(ks[2], (3 * H1,), k_gru)
    bhh = u(ks[3], (3 * H1,), k_gru)
    w1 = u(ks[4], (H2, H1), k_l1)
    b1 = u(ks[5], (H2,), k_l1)
    w2 = u(ks[6], (Y_SIZE, H2), k_l2)
    b2 = u(ks[7], (Y_SIZE,), k_l2)

    return {
        'wih_t': wih.T,                     # (x_size, 3H)
        'whh_t': whh.T,                     # (H, 3H)
        'bih': bih.reshape(1, -1),          # (1, 3H)
        'bhh': bhh.reshape(1, -1),          # (1, 3H)
        'w1_t': w1.T,                       # (H1, H2)
        'b1': b1.reshape(1, -1),            # (1, H2)
        'ln_g': jnp.ones((1, H2), jnp.float32),
        'ln_b': jnp.zeros((1, H2), jnp.float32),
        'w2_t': w2.T,                       # (H2, y_size)
        'b2': b2.reshape(1, -1),            # (1, y_size)
    }


# ---------------------------- pure-JAX reference ------------------------------
def ref_forward(x, y_features, p):
    H = H1

    def gru_step(x_t, h):
        gx = x_t @ p['wih_t'] + p['bih']
        gh = h @ p['whh_t'] + p['bhh']
        r = jax.nn.sigmoid(gx[:, :H] + gh[:, :H])
        z = jax.nn.sigmoid(gx[:, H:2 * H] + gh[:, H:2 * H])
        n = jnp.tanh(gx[:, 2 * H:] + r * gh[:, 2 * H:])
        return (1.0 - z) * n + z * h

    def fc_head(h):
        a = h @ p['w1_t'] + p['b1']
        mu = jnp.mean(a, -1, keepdims=True)
        var = jnp.mean((a - mu) ** 2, -1, keepdims=True)
        a = (a - mu) * jax.lax.rsqrt(var + LN_EPS) * p['ln_g'] + p['ln_b']
        a = jnp.maximum(a, 0.0)
        return jnp.maximum(a @ p['w2_t'] + p['b2'], 0.0)

    h = jnp.zeros((BATCH, H), jnp.float32)
    for t in range(X_HORIZON):
        h = gru_step(x[:, t, :], h)
    y_t = fc_head(h)
    preds = []
    for i in range(Y_HORIZON):
        y_in = jnp.concatenate([y_t, y_features[:, i, :]], axis=-1)
        h = gru_step(y_in, h)
        y_t = fc_head(h)
        preds.append(y_t)
    return jnp.concatenate(preds, axis=-1)


if __name__ == "__main__":
    key = jax.random.PRNGKey(0)
    k_p, k_x, k_y = jax.random.split(key, 3)
    params = init_params(k_p)
    x = jax.random.normal(k_x, (BATCH, X_HORIZON, X_SIZE), jnp.float32)
    y_features = jax.random.normal(k_y, (BATCH, Y_HORIZON, Y_FEAT_SIZE), jnp.float32)

    out = simple_occ_gru_forward(x, y_features, params)
    out = jax.block_until_ready(out)
    assert out.shape == (BATCH, Y_HORIZON)

    ref = ref_forward(x, y_features, params)
    np.testing.assert_allclose(np.asarray(out), np.asarray(ref), rtol=1e-2, atol=1e-2)

    print("KERNEL_OK")
</pallas_src>

<mosaic_0001>
module attributes {stable_mosaic.version = 11 : i64} {
  func.func @occ_gru_kernel(%arg0: memref<64x4xf32, #tpu.memory_space<vmem>>, %arg1: memref<48x3xf32, #tpu.memory_space<vmem>>, %arg2: memref<4x96xf32, #tpu.memory_space<vmem>>, %arg3: memref<1x96xf32, #tpu.memory_space<vmem>>, %arg4: memref<3x96xf32, #tpu.memory_space<vmem>>, %arg5: memref<1x96xf32, #tpu.memory_space<vmem>>, %arg6: memref<32x112xf32, #tpu.memory_space<vmem>>, %arg7: memref<1x112xf32, #tpu.memory_space<vmem>>, %arg8: memref<1x16xf32, #tpu.memory_space<vmem>>, %arg9: memref<1x16xf32, #tpu.memory_space<vmem>>, %arg10: memref<1x16xf32, #tpu.memory_space<vmem>>, %arg11: memref<1x1xf32, #tpu.memory_space<vmem>>, %arg12: memref<8x6xf32, #tpu.memory_space<vmem>>) attributes {dimension_semantics = [], scalar_prefetch = 0 : i64, scratch_operands = 0 : i64, tpu.core_type = #tpu.core_type<tc>} {
    %c0 = arith.constant 0 : index
    %c0_0 = arith.constant 0 : index
    %0 = vector.load %arg2[%c0, %c0_0] : memref<4x96xf32, #tpu.memory_space<vmem>>, vector<4x96xf32>
    %c0_1 = arith.constant 0 : index
    %c0_2 = arith.constant 0 : index
    %1 = vector.load %arg4[%c0_1, %c0_2] : memref<3x96xf32, #tpu.memory_space<vmem>>, vector<3x96xf32>
    %c0_3 = arith.constant 0 : index
    %c0_4 = arith.constant 0 : index
    %2 = vector.load %arg6[%c0_3, %c0_4] : memref<32x112xf32, #tpu.memory_space<vmem>>, vector<32x112xf32>
    %c0_5 = arith.constant 0 : index
    %c0_6 = arith.constant 0 : index
    %3 = vector.load %arg3[%c0_5, %c0_6] : memref<1x96xf32, #tpu.memory_space<vmem>>, vector<1x96xf32>
    %4 = vector.shape_cast %3 : vector<1x96xf32> to vector<1x96xf32>
    %5 = vector.broadcast %4 : vector<1x96xf32> to vector<8x96xf32>
    %c0_7 = arith.constant 0 : index
    %c0_8 = arith.constant 0 : index
    %6 = vector.load %arg7[%c0_7, %c0_8] : memref<1x112xf32, #tpu.memory_space<vmem>>, vector<1x112xf32>
    %7 = vector.shape_cast %6 : vector<1x112xf32> to vector<1x112xf32>
    %8 = vector.broadcast %7 : vector<1x112xf32> to vector<8x112xf32>
    %c0_9 = arith.constant 0 : index
    %c0_10 = arith.constant 0 : index
    %9 = vector.load %arg8[%c0_9, %c0_10] : memref<1x16xf32, #tpu.memory_space<vmem>>, vector<1x16xf32>
    %10 = vector.shape_cast %9 : vector<1x16xf32> to vector<1x16xf32>
    %11 = vector.broadcast %10 : vector<1x16xf32> to vector<8x16xf32>
    %c0_11 = arith.constant 0 : index
    %c0_12 = arith.constant 0 : index
    %12 = vector.load %arg9[%c0_11, %c0_12] : memref<1x16xf32, #tpu.memory_space<vmem>>, vector<1x16xf32>
    %13 = vector.shape_cast %12 : vector<1x16xf32> to vector<1x16xf32>
    %14 = vector.broadcast %13 : vector<1x16xf32> to vector<8x16xf32>
    %c0_13 = arith.constant 0 : index
    %c0_14 = arith.constant 0 : index
    %15 = vector.load %arg10[%c0_13, %c0_14] : memref<1x16xf32, #tpu.memory_space<vmem>>, vector<1x16xf32>
    %16 = vector.shape_cast %15 : vector<1x16xf32> to vector<1x16xf32>
    %17 = vector.broadcast %16 : vector<1x16xf32> to vector<8x16xf32>
    %c0_15 = arith.constant 0 : index
    %c0_16 = arith.constant 0 : index
    %18 = vector.load %arg11[%c0_15, %c0_16] : memref<1x1xf32, #tpu.memory_space<vmem>>, vector<1x1xf32>
    %19 = vector.shape_cast %18 : vector<1x1xf32> to vector<1x1xf32>
    %20 = vector.broadcast %19 : vector<1x1xf32> to vector<8x1xf32>
    %c0_17 = arith.constant 0 : index
    %c0_18 = arith.constant 0 : index
    %21 = vector.load %arg5[%c0_17, %c0_18] : memref<1x96xf32, #tpu.memory_space<vmem>>, vector<1x96xf32>
    %22 = vector.shape_cast %21 : vector<1x96xf32> to vector<1x96xf32>
    %23 = vector.broadcast %22 : vector<1x96xf32> to vector<64x96xf32>
    %c0_19 = arith.constant 0 : index
    %c0_20 = arith.constant 0 : index
    %24 = vector.load %arg0[%c0_19, %c0_20] : memref<64x4xf32, #tpu.memory_space<vmem>>, vector<64x4xf32>
    %cst = arith.constant dense<0.000000e+00> : vector<64x96xf32>
    %25 = tpu.matmul %24, %0, %cst {dimension_numbers = #tpu.dot_dimension_numbers<[1], [0], [0], [1], [0, 0, 1, 1], [], []>} : vector<64x4xf32>, vector<4x96xf32>, vector<64x96xf32> -> vector<64x96xf32>
    %26 = arith.addf %25, %23 : vector<64x96xf32>
    %c0_21 = arith.constant 0 : index
    %c0_22 = arith.constant 0 : index
    %27 = vector.load %arg5[%c0_21, %c0_22] : memref<1x96xf32, #tpu.memory_space<vmem>>, vector<1x96xf32>
    %28 = vector.shape_cast %27 : vector<1x96xf32> to vector<1x96xf32>
    %29 = vector.broadcast %28 : vector<1x96xf32> to vector<48x96xf32>
    %c0_23 = arith.constant 0 : index
    %c0_24 = arith.constant 0 : index
    %30 = vector.load %arg1[%c0_23, %c0_24] : memref<48x3xf32, #tpu.memory_space<vmem>>, vector<48x3xf32>
    %cst_25 = arith.constant dense<0.000000e+00> : vector<48x96xf32>
    %31 = tpu.matmul %30, %1, %cst_25 {dimension_numbers = #tpu.dot_dimension_numbers<[1], [0], [0], [1], [0, 0, 1, 1], [], []>} : vector<48x3xf32>, vector<3x96xf32>, vector<48x96xf32> -> vector<48x96xf32>
    %32 = arith.addf %31, %29 : vector<48x96xf32>
    %cst_26 = arith.constant 0.000000e+00 : f32
    %33 = vector.broadcast %cst_26 : f32 to vector<8x32xf32>
    %34 = vector.extract_strided_slice %8 {offsets = [0, 0], sizes = [8, 96], strides = [1, 1]} : vector<8x112xf32> to vector<8x96xf32>
    %35 = vector.extract_strided_slice %26 {offsets = [0, 0], sizes = [8, 96], strides = [1, 1]} : vector<64x96xf32> to vector<8x96xf32>
    %36 = vector.extract_strided_slice %35 {offsets = [0, 0], sizes = [8, 32], strides = [1, 1]} : vector<8x96xf32> to vector<8x32xf32>
    %37 = vector.extract_strided_slice %34 {offsets = [0, 0], sizes = [8, 32], strides = [1, 1]} : vector<8x96xf32> to vector<8x32xf32>
    %38 = arith.addf %36, %37 : vector<8x32xf32>
    %39 = arith.negf %38 : vector<8x32xf32>
    %40 = math.exp %39 : vector<8x32xf32>
    %cst_27 = arith.constant 1.000000e+00 : f32
    %41 = vector.broadcast %cst_27 : f32 to vector<8x32xf32>
    %42 = arith.addf %41, %40 : vector<8x32xf32>
    %43 = arith.divf %41, %42 : vector<8x32xf32>
    %44 = vector.extract_strided_slice %35 {offsets = [0, 32], sizes = [8, 32], strides = [1, 1]} : vector<8x96xf32> to vector<8x32xf32>
    %45 = vector.extract_strided_slice %34 {offsets = [0, 32], sizes = [8, 32], strides = [1, 1]} : vector<8x96xf32> to vector<8x32xf32>
    %46 = arith.addf %44, %45 : vector<8x32xf32>
    %47 = arith.negf %46 : vector<8x32xf32>
    %48 = math.exp %47 : vector<8x32xf32>
    %cst_28 = arith.constant 1.000000e+00 : f32
    %49 = vector.broadcast %cst_28 : f32 to vector<8x32xf32>
    %50 = arith.addf %49, %48 : vector<8x32xf32>
    %51 = arith.divf %49, %50 : vector<8x32xf32>
    %52 = vector.extract_strided_slice %35 {offsets = [0, 64], sizes = [8, 32], strides = [1, 1]} : vector<8x96xf32> to vector<8x32xf32>
    %53 = vector.extract_strided_slice %34 {offsets = [0, 64], sizes = [8, 32], strides = [1, 1]} : vector<8x96xf32> to vector<8x32xf32>
    %54 = arith.mulf %43, %53 : vector<8x32xf32>
    %55 = arith.addf %52, %54 : vector<8x32xf32>
    %56 = math.tanh %55 : vector<8x32xf32>
    %cst_29 = arith.constant 1.000000e+00 : f32
    %57 = vector.broadcast %cst_29 : f32 to vector<8x32xf32>
    %58 = arith.subf %57, %51 : vector<8x32xf32>
    %59 = arith.mulf %58, %56 : vector<8x32xf32>
    %60 = arith.mulf %51, %33 : vector<8x32xf32>
    %61 = arith.addf %59, %60 : vector<8x32xf32>
    %cst_30 = arith.constant dense<0.000000e+00> : vector<8x112xf32>
    %62 = tpu.matmul %61, %2, %cst_30 {dimension_numbers = #tpu.dot_dimension_numbers<[1], [0], [0], [1], [0, 0, 1, 1], [], []>} : vector<8x32xf32>, vector<32x112xf32>, vector<8x112xf32> -> vector<8x112xf32>
    %63 = arith.addf %62, %8 : vector<8x112xf32>
    %64 = vector.extract_strided_slice %63 {offsets = [0, 0], sizes = [8, 96], strides = [1, 1]} : vector<8x112xf32> to vector<8x96xf32>
    %65 = vector.extract_strided_slice %26 {offsets = [8, 0], sizes = [8, 96], strides = [1, 1]} : vector<64x96xf32> to vector<8x96xf32>
    %66 = vector.extract_strided_slice %65 {offsets = [0, 0], sizes = [8, 32], strides = [1, 1]} : vector<8x96xf32> to vector<8x32xf32>
    %67 = vector.extract_strided_slice %64 {offsets = [0, 0], sizes = [8, 32], strides = [1, 1]} : vector<8x96xf32> to vector<8x32xf32>
    %68 = arith.addf %66, %67 : vector<8x32xf32>
    %69 = arith.negf %68 : vector<8x32xf32>
    %70 = math.exp %69 : vector<8x32xf32>
    %cst_31 = arith.constant 1.000000e+00 : f32
    %71 = vector.broadcast %cst_31 : f32 to vector<8x32xf32>
    %72 = arith.addf %71, %70 : vector<8x32xf32>
    %73 = arith.divf %71, %72 : vector<8x32xf32>
    %74 = vector.extract_strided_slice %65 {offsets = [0, 32], sizes = [8, 32], strides = [1, 1]} : vector<8x96xf32> to vector<8x32xf32>
    %75 = vector.extract_strided_slice %64 {offsets = [0, 32], sizes = [8, 32], strides = [1, 1]} : vector<8x96xf32> to vector<8x32xf32>
    %76 = arith.addf %74, %75 : vector<8x32xf32>
    %77 = arith.negf %76 : vector<8x32xf32>
    %78 = math.exp %77 : vector<8x32xf32>
    %cst_32 = arith.constant 1.000000e+00 : f32
    %79 = vector.broadcast %cst_32 : f32 to vector<8x32xf32>
    %80 = arith.addf %79, %78 : vector<8x32xf32>
    %81 = arith.divf %79, %80 : vector<8x32xf32>
    %82 = vector.extract_strided_slice %65 {offsets = [0, 64], sizes = [8, 32], strides = [1, 1]} : vector<8x96xf32> to vector<8x32xf32>
    %83 = vector.extract_strided_slice %64 {offsets = [0, 64], sizes = [8, 32], strides = [1, 1]} : vector<8x96xf32> to vector<8x32xf32>
    %84 = arith.mulf %73, %83 : vector<8x32xf32>
    %85 = arith.addf %82, %84 : vector<8x32xf32>
    %86 = math.tanh %85 : vector<8x32xf32>
    %cst_33 = arith.constant 1.000000e+00 : f32
    %87 = vector.broadcast %cst_33 : f32 to vector<8x32xf32>
    %88 = arith.subf %87, %81 : vector<8x32xf32>
    %89 = arith.mulf %88, %86 : vector<8x32xf32>
    %90 = arith.mulf %81, %61 : vector<8x32xf32>
    %91 = arith.addf %89, %90 : vector<8x32xf32>
    %cst_34 = arith.constant dense<0.000000e+00> : vector<8x112xf32>
    %92 = tpu.matmul %91, %2, %cst_34 {dimension_numbers = #tpu.dot_dimension_numbers<[1], [0], [0], [1], [0, 0, 1, 1], [], []>} : vector<8x32xf32>, vector<32x112xf32>, vector<8x112xf32> -> vector<8x112xf32>
    %93 = arith.addf %92, %8 : vector<8x112xf32>
    %94 = vector.extract_strided_slice %93 {offsets = [0, 0], sizes = [8, 96], strides = [1, 1]} : vector<8x112xf32> to vector<8x96xf32>
    %95 = vector.extract_strided_slice %26 {offsets = [16, 0], sizes = [8, 96], strides = [1, 1]} : vector<64x96xf32> to vector<8x96xf32>
    %96 = vector.extract_strided_slice %95 {offsets = [0, 0], sizes = [8, 32], strides = [1, 1]} : vector<8x96xf32> to vector<8x32xf32>
    %97 = vector.extract_strided_slice %94 {offsets = [0, 0], sizes = [8, 32], strides = [1, 1]} : vector<8x96xf32> to vector<8x32xf32>
    %98 = arith.addf %96, %97 : vector<8x32xf32>
    %99 = arith.negf %98 : vector<8x32xf32>
    %100 = math.exp %99 : vector<8x32xf32>
    %cst_35 = arith.constant 1.000000e+00 : f32
    %101 = vector.broadcast %cst_35 : f32 to vector<8x32xf32>
    %102 = arith.addf %101, %100 : vector<8x32xf32>
    %103 = arith.divf %101, %102 : vector<8x32xf32>
    %104 = vector.extract_strided_slice %95 {offsets = [0, 32], sizes = [8, 32], strides = [1, 1]} : vector<8x96xf32> to vector<8x32xf32>
    %105 = vector.extract_strided_slice %94 {offsets = [0, 32], sizes = [8, 32], strides = [1, 1]} : vector<8x96xf32> to vector<8x32xf32>
    %106 = arith.addf %104, %105 : vector<8x32xf32>
    %107 = arith.negf %106 : vector<8x32xf32>
    %108 = math.exp %107 : vector<8x32xf32>
    %cst_36 = arith.constant 1.000000e+00 : f32
    %109 = vector.broadcast %cst_36 : f32 to vector<8x32xf32>
    %110 = arith.addf %109, %108 : vector<8x32xf32>
    %111 = arith.divf %109, %110 : vector<8x32xf32>
    %112 = vector.extract_strided_slice %95 {offsets = [0, 64], sizes = [8, 32], strides = [1, 1]} : vector<8x96xf32> to vector<8x32xf32>
    %113 = vector.extract_strided_slice %94 {offsets = [0, 64], sizes = [8, 32], strides = [1, 1]} : vector<8x96xf32> to vector<8x32xf32>
    %114 = arith.mulf %103, %113 : vector<8x32xf32>
    %115 = arith.addf %112, %114 : vector<8x32xf32>
    %116 = math.tanh %115 : vector<8x32xf32>
    %cst_37 = arith.constant 1.000000e+00 : f32
    %117 = vector.broadcast %cst_37 : f32 to vector<8x32xf32>
    %118 = arith.subf %117, %111 : vector<8x32xf32>
    %119 = arith.mulf %118, %116 : vector<8x32xf32>
    %120 = arith.mulf %111, %91 : vector<8x32xf32>
    %121 = arith.addf %119, %120 : vector<8x32xf32>
    %cst_38 = arith.constant dense<0.000000e+00> : vector<8x112xf32>
    %122 = tpu.matmul %121, %2, %cst_38 {dimension_numbers = #tpu.dot_dimension_numbers<[1], [0], [0], [1], [0, 0, 1, 1], [], []>} : vector<8x32xf32>, vector<32x112xf32>, vector<8x112xf32> -> vector<8x112xf32>
    %123 = arith.addf %122, %8 : vector<8x112xf32>
    %124 = vector.extract_strided_slice %123 {offsets = [0, 0], sizes = [8, 96], strides = [1, 1]} : vector<8x112xf32> to vector<8x96xf32>
    %125 = vector.extract_strided_slice %26 {offsets = [24, 0], sizes = [8, 96], strides = [1, 1]} : vector<64x96xf32> to vector<8x96xf32>
    %126 = vector.extract_strided_slice %125 {offsets = [0, 0], sizes = [8, 32], strides = [1, 1]} : vector<8x96xf32> to vector<8x32xf32>
    %127 = vector.extract_strided_slice %124 {offsets = [0, 0], sizes = [8, 32], strides = [1, 1]} : vector<8x96xf32> to vector<8x32xf32>
    %128 = arith.addf %126, %127 : vector<8x32xf32>
    %129 = arith.negf %128 : vector<8x32xf32>
    %130 = math.exp %129 : vector<8x32xf32>
    %cst_39 = arith.constant 1.000000e+00 : f32
    %131 = vector.broadcast %cst_39 : f32 to vector<8x32xf32>
    %132 = arith.addf %131, %130 : vector<8x32xf32>
    %133 = arith.divf %131, %132 : vector<8x32xf32>
    %134 = vector.extract_strided_slice %125 {offsets = [0, 32], sizes = [8, 32], strides = [1, 1]} : vector<8x96xf32> to vector<8x32xf32>
    %135 = vector.extract_strided_slice %124 {offsets = [0, 32], sizes = [8, 32], strides = [1, 1]} : vector<8x96xf32> to vector<8x32xf32>
    %136 = arith.addf %134, %135 : vector<8x32xf32>
    %137 = arith.negf %136 : vector<8x32xf32>
    %138 = math.exp %137 : vector<8x32xf32>
    %cst_40 = arith.constant 1.000000e+00 : f32
    %139 = vector.broadcast %cst_40 : f32 to vector<8x32xf32>
    %140 = arith.addf %139, %138 : vector<8x32xf32>
    %141 = arith.divf %139, %140 : vector<8x32xf32>
    %142 = vector.extract_strided_slice %125 {offsets = [0, 64], sizes = [8, 32], strides = [1, 1]} : vector<8x96xf32> to vector<8x32xf32>
    %143 = vector.extract_strided_slice %124 {offsets = [0, 64], sizes = [8, 32], strides = [1, 1]} : vector<8x96xf32> to vector<8x32xf32>
    %144 = arith.mulf %133, %143 : vector<8x32xf32>
    %145 = arith.addf %142, %144 : vector<8x32xf32>
    %146 = math.tanh %145 : vector<8x32xf32>
    %cst_41 = arith.constant 1.000000e+00 : f32
    %147 = vector.broadcast %cst_41 : f32 to vector<8x32xf32>
    %148 = arith.subf %147, %141 : vector<8x32xf32>
    %149 = arith.mulf %148, %146 : vector<8x32xf32>
    %150 = arith.mulf %141, %121 : vector<8x32xf32>
    %151 = arith.addf %149, %150 : vector<8x32xf32>
    %cst_42 = arith.constant dense<0.000000e+00> : vector<8x112xf32>
    %152 = tpu.matmul %151, %2, %cst_42 {dimension_numbers = #tpu.dot_dimension_numbers<[1], [0], [0], [1], [0, 0, 1, 1], [], []>} : vector<8x32xf32>, vector<32x112xf32>, vector<8x112xf32> -> vector<8x112xf32>
    %153 = arith.addf %152, %8 : vector<8x112xf32>
    %154 = vector.extract_strided_slice %153 {offsets = [0, 0], sizes = [8, 96], strides = [1, 1]} : vector<8x112xf32> to vector<8x96xf32>
    %155 = vector.extract_strided_slice %26 {offsets = [32, 0], sizes = [8, 96], strides = [1, 1]} : vector<64x96xf32> to vector<8x96xf32>
    %156 = vector.extract_strided_slice %155 {offsets = [0, 0], sizes = [8, 32], strides = [1, 1]} : vector<8x96xf32> to vector<8x32xf32>
    %157 = vector.extract_strided_slice %154 {offsets = [0, 0], sizes = [8, 32], strides = [1, 1]} : vector<8x96xf32> to vector<8x32xf32>
    %158 = arith.addf %156, %157 : vector<8x32xf32>
    %159 = arith.negf %158 : vector<8x32xf32>
    %160 = math.exp %159 : vector<8x32xf32>
    %cst_43 = arith.constant 1.000000e+00 : f32
    %161 = vector.broadcast %cst_43 : f32 to vector<8x32xf32>
    %162 = arith.addf %161, %160 : vector<8x32xf32>
    %163 = arith.divf %161, %162 : vector<8x32xf32>
    %164 = vector.extract_strided_slice %155 {offsets = [0, 32], sizes = [8, 32], strides = [1, 1]} : vector<8x96xf32> to vector<8x32xf32>
    %165 = vector.extract_strided_slice %154 {offsets = [0, 32], sizes = [8, 32], strides = [1, 1]} : vector<8x96xf32> to vector<8x32xf32>
    %166 = arith.addf %164, %165 : vector<8x32xf32>
    %167 = arith.negf %166 : vector<8x32xf32>
    %168 = math.exp %167 : vector<8x32xf32>
    %cst_44 = arith.constant 1.000000e+00 : f32
    %169 = vector.broadcast %cst_44 : f32 to vector<8x32xf32>
    %170 = arith.addf %169, %168 : vector<8x32xf32>
    %171 = arith.divf %169, %170 : vector<8x32xf32>
    %172 = vector.extract_strided_slice %155 {offsets = [0, 64], sizes = [8, 32], strides = [1, 1]} : vector<8x96xf32> to vector<8x32xf32>
    %173 = vector.extract_strided_slice %154 {offsets = [0, 64], sizes = [8, 32], strides = [1, 1]} : vector<8x96xf32> to vector<8x32xf32>
    %174 = arith.mulf %163, %173 : vector<8x32xf32>
    %175 = arith.addf %172, %174 : vector<8x32xf32>
    %176 = math.tanh %175 : vector<8x32xf32>
    %cst_45 = arith.constant 1.000000e+00 : f32
    %177 = vector.broadcast %cst_45 : f32 to vector<8x32xf32>
    %178 = arith.subf %177, %171 : vector<8x32xf32>
    %179 = arith.mulf %178, %176 : vector<8x32xf32>
    %180 = arith.mulf %171, %151 : vector<8x32xf32>
    %181 = arith.addf %179, %180 : vector<8x32xf32>
    %cst_46 = arith.constant dense<0.000000e+00> : vector<8x112xf32>
    %182 = tpu.matmul %181, %2, %cst_46 {dimension_numbers = #tpu.dot_dimension_numbers<[1], [0], [0], [1], [0, 0, 1, 1], [], []>} : vector<8x32xf32>, vector<32x112xf32>, vector<8x112xf32> -> vector<8x112xf32>
    %183 = arith.addf %182, %8 : vector<8x112xf32>
    %184 = vector.extract_strided_slice %183 {offsets = [0, 0], sizes = [8, 96], strides = [1, 1]} : vector<8x112xf32> to vector<8x96xf32>
    %185 = vector.extract_strided_slice %26 {offsets = [40, 0], sizes = [8, 96], strides = [1, 1]} : vector<64x96xf32> to vector<8x96xf32>
    %186 = vector.extract_strided_slice %185 {offsets = [0, 0], sizes = [8, 32], strides = [1, 1]} : vector<8x96xf32> to vector<8x32xf32>
    %187 = vector.extract_strided_slice %184 {offsets = [0, 0], sizes = [8, 32], strides = [1, 1]} : vector<8x96xf32> to vector<8x32xf32>
    %188 = arith.addf %186, %187 : vector<8x32xf32>
    %189 = arith.negf %188 : vector<8x32xf32>
    %190 = math.exp %189 : vector<8x32xf32>
    %cst_47 = arith.constant 1.000000e+00 : f32
    %191 = vector.broadcast %cst_47 : f32 to vector<8x32xf32>
    %192 = arith.addf %191, %190 : vector<8x32xf32>
    %193 = arith.divf %191, %192 : vector<8x32xf32>
    %194 = vector.extract_strided_slice %185 {offsets = [0, 32], sizes = [8, 32], strides = [1, 1]} : vector<8x96xf32> to vector<8x32xf32>
    %195 = vector.extract_strided_slice %184 {offsets = [0, 32], sizes = [8, 32], strides = [1, 1]} : vector<8x96xf32> to vector<8x32xf32>
    %196 = arith.addf %194, %195 : vector<8x32xf32>
    %197 = arith.negf %196 : vector<8x32xf32>
    %198 = math.exp %197 : vector<8x32xf32>
    %cst_48 = arith.constant 1.000000e+00 : f32
    %199 = vector.broadcast %cst_48 : f32 to vector<8x32xf32>
    %200 = arith.addf %199, %198 : vector<8x32xf32>
    %201 = arith.divf %199, %200 : vector<8x32xf32>
    %202 = vector.extract_strided_slice %185 {offsets = [0, 64], sizes = [8, 32], strides = [1, 1]} : vector<8x96xf32> to vector<8x32xf32>
    %203 = vector.extract_strided_slice %184 {offsets = [0, 64], sizes = [8, 32], strides = [1, 1]} : vector<8x96xf32> to vector<8x32xf32>
    %204 = arith.mulf %193, %203 : vector<8x32xf32>
    %205 = arith.addf %202, %204 : vector<8x32xf32>
    %206 = math.tanh %205 : vector<8x32xf32>
    %cst_49 = arith.constant 1.000000e+00 : f32
    %207 = vector.broadcast %cst_49 : f32 to vector<8x32xf32>
    %208 = arith.subf %207, %201 : vector<8x32xf32>
    %209 = arith.mulf %208, %206 : vector<8x32xf32>
    %210 = arith.mulf %201, %181 : vector<8x32xf32>
    %211 = arith.addf %209, %210 : vector<8x32xf32>
    %cst_50 = arith.constant dense<0.000000e+00> : vector<8x112xf32>
    %212 = tpu.matmul %211, %2, %cst_50 {dimension_numbers = #tpu.dot_dimension_numbers<[1], [0], [0], [1], [0, 0, 1, 1], [], []>} : vector<8x32xf32>, vector<32x112xf32>, vector<8x112xf32> -> vector<8x112xf32>
    %213 = arith.addf %212, %8 : vector<8x112xf32>
    %214 = vector.extract_strided_slice %213 {offsets = [0, 0], sizes = [8, 96], strides = [1, 1]} : vector<8x112xf32> to vector<8x96xf32>
    %215 = vector.extract_strided_slice %26 {offsets = [48, 0], sizes = [8, 96], strides = [1, 1]} : vector<64x96xf32> to vector<8x96xf32>
    %216 = vector.extract_strided_slice %215 {offsets = [0, 0], sizes = [8, 32], strides = [1, 1]} : vector<8x96xf32> to vector<8x32xf32>
    %217 = vector.extract_strided_slice %214 {offsets = [0, 0], sizes = [8, 32], strides = [1, 1]} : vector<8x96xf32> to vector<8x32xf32>
    %218 = arith.addf %216, %217 : vector<8x32xf32>
    %219 = arith.negf %218 : vector<8x32xf32>
    %220 = math.exp %219 : vector<8x32xf32>
    %cst_51 = arith.constant 1.000000e+00 : f32
    %221 = vector.broadcast %cst_51 : f32 to vector<8x32xf32>
    %222 = arith.addf %221, %220 : vector<8x32xf32>
    %223 = arith.divf %221, %222 : vector<8x32xf32>
    %224 = vector.extract_strided_slice %215 {offsets = [0, 32], sizes = [8, 32], strides = [1, 1]} : vector<8x96xf32> to vector<8x32xf32>
    %225 = vector.extract_strided_slice %214 {offsets = [0, 32], sizes = [8, 32], strides = [1, 1]} : vector<8x96xf32> to vector<8x32xf32>
    %226 = arith.addf %224, %225 : vector<8x32xf32>
    %227 = arith.negf %226 : vector<8x32xf32>
    %228 = math.exp %227 : vector<8x32xf32>
    %cst_52 = arith.constant 1.000000e+00 : f32
    %229 = vector.broadcast %cst_52 : f32 to vector<8x32xf32>
    %230 = arith.addf %229, %228 : vector<8x32xf32>
    %231 = arith.divf %229, %230 : vector<8x32xf32>
    %232 = vector.extract_strided_slice %215 {offsets = [0, 64], sizes = [8, 32], strides = [1, 1]} : vector<8x96xf32> to vector<8x32xf32>
    %233 = vector.extract_strided_slice %214 {offsets = [0, 64], sizes = [8, 32], strides = [1, 1]} : vector<8x96xf32> to vector<8x32xf32>
    %234 = arith.mulf %223, %233 : vector<8x32xf32>
    %235 = arith.addf %232, %234 : vector<8x32xf32>
    %236 = math.tanh %235 : vector<8x32xf32>
    %cst_53 = arith.constant 1.000000e+00 : f32
    %237 = vector.broadcast %cst_53 : f32 to vector<8x32xf32>
    %238 = arith.subf %237, %231 : vector<8x32xf32>
    %239 = arith.mulf %238, %236 : vector<8x32xf32>
    %240 = arith.mulf %231, %211 : vector<8x32xf32>
    %241 = arith.addf %239, %240 : vector<8x32xf32>
    %cst_54 = arith.constant dense<0.000000e+00> : vector<8x112xf32>
    %242 = tpu.matmul %241, %2, %cst_54 {dimension_numbers = #tpu.dot_dimension_numbers<[1], [0], [0], [1], [0, 0, 1, 1], [], []>} : vector<8x32xf32>, vector<32x112xf32>, vector<8x112xf32> -> vector<8x112xf32>
    %243 = arith.addf %242, %8 : vector<8x112xf32>
    %244 = vector.extract_strided_slice %243 {offsets = [0, 0], sizes = [8, 96], strides = [1, 1]} : vector<8x112xf32> to vector<8x96xf32>
    %245 = vector.extract_strided_slice %26 {offsets = [56, 0], sizes = [8, 96], strides = [1, 1]} : vector<64x96xf32> to vector<8x96xf32>
    %246 = vector.extract_strided_slice %245 {offsets = [0, 0], sizes = [8, 32], strides = [1, 1]} : vector<8x96xf32> to vector<8x32xf32>
    %247 = vector.extract_strided_slice %244 {offsets = [0, 0], sizes = [8, 32], strides = [1, 1]} : vector<8x96xf32> to vector<8x32xf32>
    %248 = arith.addf %246, %247 : vector<8x32xf32>
    %249 = arith.negf %248 : vector<8x32xf32>
    %250 = math.exp %249 : vector<8x32xf32>
    %cst_55 = arith.constant 1.000000e+00 : f32
    %251 = vector.broadcast %cst_55 : f32 to vector<8x32xf32>
    %252 = arith.addf %251, %250 : vector<8x32xf32>
    %253 = arith.divf %251, %252 : vector<8x32xf32>
    %254 = vector.extract_strided_slice %245 {offsets = [0, 32], sizes = [8, 32], strides = [1, 1]} : vector<8x96xf32> to vector<8x32xf32>
    %255 = vector.extract_strided_slice %244 {offsets = [0, 32], sizes = [8, 32], strides = [1, 1]} : vector<8x96xf32> to vector<8x32xf32>
    %256 = arith.addf %254, %255 : vector<8x32xf32>
    %257 = arith.negf %256 : vector<8x32xf32>
    %258 = math.exp %257 : vector<8x32xf32>
    %cst_56 = arith.constant 1.000000e+00 : f32
    %259 = vector.broadcast %cst_56 : f32 to vector<8x32xf32>
    %260 = arith.addf %259, %258 : vector<8x32xf32>
    %261 = arith.divf %259, %260 : vector<8x32xf32>
    %262 = vector.extract_strided_slice %245 {offsets = [0, 64], sizes = [8, 32], strides = [1, 1]} : vector<8x96xf32> to vector<8x32xf32>
    %263 = vector.extract_strided_slice %244 {offsets = [0, 64], sizes = [8, 32], strides = [1, 1]} : vector<8x96xf32> to vector<8x32xf32>
    %264 = arith.mulf %253, %263 : vector<8x32xf32>
    %265 = arith.addf %262, %264 : vector<8x32xf32>
    %266 = math.tanh %265 : vector<8x32xf32>
    %cst_57 = arith.constant 1.000000e+00 : f32
    %267 = vector.broadcast %cst_57 : f32 to vector<8x32xf32>
    %268 = arith.subf %267, %261 : vector<8x32xf32>
    %269 = arith.mulf %268, %266 : vector<8x32xf32>
    %270 = arith.mulf %261, %241 : vector<8x32xf32>
    %271 = arith.addf %269, %270 : vector<8x32xf32>
    %cst_58 = arith.constant dense<0.000000e+00> : vector<8x112xf32>
    %272 = tpu.matmul %271, %2, %cst_58 {dimension_numbers = #tpu.dot_dimension_numbers<[1], [0], [0], [1], [0, 0, 1, 1], [], []>} : vector<8x32xf32>, vector<32x112xf32>, vector<8x112xf32> -> vector<8x112xf32>
    %273 = arith.addf %272, %8 : vector<8x112xf32>
    %274 = vector.extract_strided_slice %273 {offsets = [0, 0], sizes = [8, 96], strides = [1, 1]} : vector<8x112xf32> to vector<8x96xf32>
    %275 = vector.extract_strided_slice %273 {offsets = [0, 96], sizes = [8, 16], strides = [1, 1]} : vector<8x112xf32> to vector<8x16xf32>
    %cst_59 = arith.constant dense<0.000000e+00> : vector<8xf32>
    %276 = vector.multi_reduction <add>, %275, %cst_59 [1] : vector<8x16xf32> to vector<8xf32>
    %277 = vector.shape_cast %276 : vector<8xf32> to vector<8x1xf32>
    %cst_60 = arith.constant 1.600000e+01 : f32
    %278 = vector.broadcast %cst_60 : f32 to vector<8x1xf32>
    %279 = arith.divf %277, %278 : vector<8x1xf32>
    %280 = vector.broadcast %279 : vector<8x1xf32> to vector<8x16xf32>
    %281 = arith.subf %275, %280 : vector<8x16xf32>
    %282 = arith.mulf %281, %281 : vector<8x16xf32>
    %cst_61 = arith.constant dense<0.000000e+00> : vector<8xf32>
    %283 = vector.multi_reduction <add>, %282, %cst_61 [1] : vector<8x16xf32> to vector<8xf32>
    %284 = vector.shape_cast %283 : vector<8xf32> to vector<8x1xf32>
    %cst_62 = arith.constant 1.600000e+01 : f32
    %285 = vector.broadcast %cst_62 : f32 to vector<8x1xf32>
    %286 = arith.divf %284, %285 : vector<8x1xf32>
    %287 = vector.broadcast %279 : vector<8x1xf32> to vector<8x16xf32>
    %288 = arith.subf %275, %287 : vector<8x16xf32>
    %cst_63 = arith.constant 9.99999974E-6 : f32
    %289 = vector.broadcast %cst_63 : f32 to vector<8x1xf32>
    %290 = arith.addf %286, %289 : vector<8x1xf32>
    %291 = math.rsqrt %290 : vector<8x1xf32>
    %292 = vector.broadcast %291 : vector<8x1xf32> to vector<8x16xf32>
    %293 = arith.mulf %288, %292 : vector<8x16xf32>
    %294 = arith.mulf %293, %11 : vector<8x16xf32>
    %295 = arith.addf %294, %14 : vector<8x16xf32>
    %cst_64 = arith.constant 0.000000e+00 : f32
    %296 = vector.broadcast %cst_64 : f32 to vector<8x16xf32>
    %297 = arith.maximumf %295, %296 : vector<8x16xf32>
    %298 = arith.mulf %297, %17 : vector<8x16xf32>
    %cst_65 = arith.constant dense<0.000000e+00> : vector<8xf32>
    %299 = vector.multi_reduction <add>, %298, %cst_65 [1] : vector<8x16xf32> to vector<8xf32>
    %300 = vector.shape_cast %299 : vector<8xf32> to vector<8x1xf32>
    %301 = arith.addf %300, %20 : vector<8x1xf32>
    %cst_66 = arith.constant 0.000000e+00 : f32
    %302 = vector.broadcast %cst_66 : f32 to vector<8x1xf32>
    %303 = arith.maximumf %301, %302 : vector<8x1xf32>
    %304 = vector.extract_strided_slice %32 {offsets = [0, 0], sizes = [8, 96], strides = [1, 1]} : vector<48x96xf32> to vector<8x96xf32>
    %305 = vector.broadcast %303 : vector<8x1xf32> to vector<8x96xf32>
    %306 = arith.mulf %305, %5 : vector<8x96xf32>
    %307 = arith.addf %304, %306 : vector<8x96xf32>
    %308 = vector.extract_strided_slice %307 {offsets = [0, 0], sizes = [8, 32], strides = [1, 1]} : vector<8x96xf32> to vector<8x32xf32>
    %309 = vector.extract_strided_slice %274 {offsets = [0, 0], sizes = [8, 32], strides = [1, 1]} : vector<8x96xf32> to vector<8x32xf32>
    %310 = arith.addf %308, %309 : vector<8x32xf32>
    %311 = arith.negf %310 : vector<8x32xf32>
    %312 = math.exp %311 : vector<8x32xf32>
    %cst_67 = arith.constant 1.000000e+00 : f32
    %313 = vector.broadcast %cst_67 : f32 to vector<8x32xf32>
    %314 = arith.addf %313, %312 : vector<8x32xf32>
    %315 = arith.divf %313, %314 : vector<8x32xf32>
    %316 = vector.extract_strided_slice %307 {offsets = [0, 32], sizes = [8, 32], strides = [1, 1]} : vector<8x96xf32> to vector<8x32xf32>
    %317 = vector.extract_strided_slice %274 {offsets = [0, 32], sizes = [8, 32], strides = [1, 1]} : vector<8x96xf32> to vector<8x32xf32>
    %318 = arith.addf %316, %317 : vector<8x32xf32>
    %319 = arith.negf %318 : vector<8x32xf32>
    %320 = math.exp %319 : vector<8x32xf32>
    %cst_68 = arith.constant 1.000000e+00 : f32
    %321 = vector.broadcast %cst_68 : f32 to vector<8x32xf32>
    %322 = arith.addf %321, %320 : vector<8x32xf32>
    %323 = arith.divf %321, %322 : vector<8x32xf32>
    %324 = vector.extract_strided_slice %307 {offsets = [0, 64], sizes = [8, 32], strides = [1, 1]} : vector<8x96xf32> to vector<8x32xf32>
    %325 = vector.extract_strided_slice %274 {offsets = [0, 64], sizes = [8, 32], strides = [1, 1]} : vector<8x96xf32> to vector<8x32xf32>
    %326 = arith.mulf %315, %325 : vector<8x32xf32>
    %327 = arith.addf %324, %326 : vector<8x32xf32>
    %328 = math.tanh %327 : vector<8x32xf32>
    %cst_69 = arith.constant 1.000000e+00 : f32
    %329 = vector.broadcast %cst_69 : f32 to vector<8x32xf32>
    %330 = arith.subf %329, %323 : vector<8x32xf32>
    %331 = arith.mulf %330, %328 : vector<8x32xf32>
    %332 = arith.mulf %323, %271 : vector<8x32xf32>
    %333 = arith.addf %331, %332 : vector<8x32xf32>
    %cst_70 = arith.constant dense<0.000000e+00> : vector<8x112xf32>
    %334 = tpu.matmul %333, %2, %cst_70 {dimension_numbers = #tpu.dot_dimension_numbers<[1], [0], [0], [1], [0, 0, 1, 1], [], []>} : vector<8x32xf32>, vector<32x112xf32>, vector<8x112xf32> -> vector<8x112xf32>
    %335 = arith.addf %334, %8 : vector<8x112xf32>
    %336 = vector.extract_strided_slice %335 {offsets = [0, 0], sizes = [8, 96], strides = [1, 1]} : vector<8x112xf32> to vector<8x96xf32>
    %337 = vector.extract_strided_slice %335 {offsets = [0, 96], sizes = [8, 16], strides = [1, 1]} : vector<8x112xf32> to vector<8x16xf32>
    %cst_71 = arith.constant dense<0.000000e+00> : vector<8xf32>
    %338 = vector.multi_reduction <add>, %337, %cst_71 [1] : vector<8x16xf32> to vector<8xf32>
    %339 = vector.shape_cast %338 : vector<8xf32> to vector<8x1xf32>
    %cst_72 = arith.constant 1.600000e+01 : f32
    %340 = vector.broadcast %cst_72 : f32 to vector<8x1xf32>
    %341 = arith.divf %339, %340 : vector<8x1xf32>
    %342 = vector.broadcast %341 : vector<8x1xf32> to vector<8x16xf32>
    %343 = arith.subf %337, %342 : vector<8x16xf32>
    %344 = arith.mulf %343, %343 : vector<8x16xf32>
    %cst_73 = arith.constant dense<0.000000e+00> : vector<8xf32>
    %345 = vector.multi_reduction <add>, %344, %cst_73 [1] : vector<8x16xf32> to vector<8xf32>
    %346 = vector.shape_cast %345 : vector<8xf32> to vector<8x1xf32>
    %cst_74 = arith.constant 1.600000e+01 : f32
    %347 = vector.broadcast %cst_74 : f32 to vector<8x1xf32>
    %348 = arith.divf %346, %347 : vector<8x1xf32>
    %349 = vector.broadcast %341 : vector<8x1xf32> to vector<8x16xf32>
    %350 = arith.subf %337, %349 : vector<8x16xf32>
    %cst_75 = arith.constant 9.99999974E-6 : f32
    %351 = vector.broadcast %cst_75 : f32 to vector<8x1xf32>
    %352 = arith.addf %348, %351 : vector<8x1xf32>
    %353 = math.rsqrt %352 : vector<8x1xf32>
    %354 = vector.broadcast %353 : vector<8x1xf32> to vector<8x16xf32>
    %355 = arith.mulf %350, %354 : vector<8x16xf32>
    %356 = arith.mulf %355, %11 : vector<8x16xf32>
    %357 = arith.addf %356, %14 : vector<8x16xf32>
    %cst_76 = arith.constant 0.000000e+00 : f32
    %358 = vector.broadcast %cst_76 : f32 to vector<8x16xf32>
    %359 = arith.maximumf %357, %358 : vector<8x16xf32>
    %360 = arith.mulf %359, %17 : vector<8x16xf32>
    %cst_77 = arith.constant dense<0.000000e+00> : vector<8xf32>
    %361 = vector.multi_reduction <add>, %360, %cst_77 [1] : vector<8x16xf32> to vector<8xf32>
    %362 = vector.shape_cast %361 : vector<8xf32> to vector<8x1xf32>
    %363 = arith.addf %362, %20 : vector<8x1xf32>
    %cst_78 = arith.constant 0.000000e+00 : f32
    %364 = vector.broadcast %cst_78 : f32 to vector<8x1xf32>
    %365 = arith.maximumf %363, %364 : vector<8x1xf32>
    %c0_79 = arith.constant 0 : index
    %c0_80 = arith.constant 0 : index
    %366 = vector.load %arg12[%c0_79, %c0_80] : memref<8x6xf32, #tpu.memory_space<vmem>>, vector<8x1xf32>
    tpu.vector_store %arg12[%c0_79, %c0_80], %365 {strides = array<i32>} : memref<8x6xf32, #tpu.memory_space<vmem>>, vector<8x1xf32>,
    %367 = vector.extract_strided_slice %32 {offsets = [8, 0], sizes = [8, 96], strides = [1, 1]} : vector<48x96xf32> to vector<8x96xf32>
    %368 = vector.broadcast %365 : vector<8x1xf32> to vector<8x96xf32>
    %369 = arith.mulf %368, %5 : vector<8x96xf32>
    %370 = arith.addf %367, %369 : vector<8x96xf32>
    %371 = vector.extract_strided_slice %370 {offsets = [0, 0], sizes = [8, 32], strides = [1, 1]} : vector<8x96xf32> to vector<8x32xf32>
    %372 = vector.extract_strided_slice %336 {offsets = [0, 0], sizes = [8, 32], strides = [1, 1]} : vector<8x96xf32> to vector<8x32xf32>
    %373 = arith.addf %371, %372 : vector<8x32xf32>
    %374 = arith.negf %373 : vector<8x32xf32>
    %375 = math.exp %374 : vector<8x32xf32>
    %cst_81 = arith.constant 1.000000e+00 : f32
    %376 = vector.broadcast %cst_81 : f32 to vector<8x32xf32>
    %377 = arith.addf %376, %375 : vector<8x32xf32>
    %378 = arith.divf %376, %377 : vector<8x32xf32>
    %379 = vector.extract_strided_slice %370 {offsets = [0, 32], sizes = [8, 32], strides = [1, 1]} : vector<8x96xf32> to vector<8x32xf32>
    %380 = vector.extract_strided_slice %336 {offsets = [0, 32], sizes = [8, 32], strides = [1, 1]} : vector<8x96xf32> to vector<8x32xf32>
    %381 = arith.addf %379, %380 : vector<8x32xf32>
    %382 = arith.negf %381 : vector<8x32xf32>
    %383 = math.exp %382 : vector<8x32xf32>
    %cst_82 = arith.constant 1.000000e+00 : f32
    %384 = vector.broadcast %cst_82 : f32 to vector<8x32xf32>
    %385 = arith.addf %384, %383 : vector<8x32xf32>
    %386 = arith.divf %384, %385 : vector<8x32xf32>
    %387 = vector.extract_strided_slice %370 {offsets = [0, 64], sizes = [8, 32], strides = [1, 1]} : vector<8x96xf32> to vector<8x32xf32>
    %388 = vector.extract_strided_slice %336 {offsets = [0, 64], sizes = [8, 32], strides = [1, 1]} : vector<8x96xf32> to vector<8x32xf32>
    %389 = arith.mulf %378, %388 : vector<8x32xf32>
    %390 = arith.addf %387, %389 : vector<8x32xf32>
    %391 = math.tanh %390 : vector<8x32xf32>
    %cst_83 = arith.constant 1.000000e+00 : f32
    %392 = vector.broadcast %cst_83 : f32 to vector<8x32xf32>
    %393 = arith.subf %392, %386 : vector<8x32xf32>
    %394 = arith.mulf %393, %391 : vector<8x32xf32>
    %395 = arith.mulf %386, %333 : vector<8x32xf32>
    %396 = arith.addf %394, %395 : vector<8x32xf32>
    %cst_84 = arith.constant dense<0.000000e+00> : vector<8x112xf32>
    %397 = tpu.matmul %396, %2, %cst_84 {dimension_numbers = #tpu.dot_dimension_numbers<[1], [0], [0], [1], [0, 0, 1, 1], [], []>} : vector<8x32xf32>, vector<32x112xf32>, vector<8x112xf32> -> vector<8x112xf32>
    %398 = arith.addf %397, %8 : vector<8x112xf32>
    %399 = vector.extract_strided_slice %398 {offsets = [0, 0], sizes = [8, 96], strides = [1, 1]} : vector<8x112xf32> to vector<8x96xf32>
    %400 = vector.extract_strided_slice %398 {offsets = [0, 96], sizes = [8, 16], strides = [1, 1]} : vector<8x112xf32> to vector<8x16xf32>
    %cst_85 = arith.constant dense<0.000000e+00> : vector<8xf32>
    %401 = vector.multi_reduction <add>, %400, %cst_85 [1] : vector<8x16xf32> to vector<8xf32>
    %402 = vector.shape_cast %401 : vector<8xf32> to vector<8x1xf32>
    %cst_86 = arith.constant 1.600000e+01 : f32
    %403 = vector.broadcast %cst_86 : f32 to vector<8x1xf32>
    %404 = arith.divf %402, %403 : vector<8x1xf32>
    %405 = vector.broadcast %404 : vector<8x1xf32> to vector<8x16xf32>
    %406 = arith.subf %400, %405 : vector<8x16xf32>
    %407 = arith.mulf %406, %406 : vector<8x16xf32>
    %cst_87 = arith.constant dense<0.000000e+00> : vector<8xf32>
    %408 = vector.multi_reduction <add>, %407, %cst_87 [1] : vector<8x16xf32> to vector<8xf32>
    %409 = vector.shape_cast %408 : vector<8xf32> to vector<8x1xf32>
    %cst_88 = arith.constant 1.600000e+01 : f32
    %410 = vector.broadcast %cst_88 : f32 to vector<8x1xf32>
    %411 = arith.divf %409, %410 : vector<8x1xf32>
    %412 = vector.broadcast %404 : vector<8x1xf32> to vector<8x16xf32>
    %413 = arith.subf %400, %412 : vector<8x16xf32>
    %cst_89 = arith.constant 9.99999974E-6 : f32
    %414 = vector.broadcast %cst_89 : f32 to vector<8x1xf32>
    %415 = arith.addf %411, %414 : vector<8x1xf32>
    %416 = math.rsqrt %415 : vector<8x1xf32>
    %417 = vector.broadcast %416 : vector<8x1xf32> to vector<8x16xf32>
    %418 = arith.mulf %413, %417 : vector<8x16xf32>
    %419 = arith.mulf %418, %11 : vector<8x16xf32>
    %420 = arith.addf %419, %14 : vector<8x16xf32>
    %cst_90 = arith.constant 0.000000e+00 : f32
    %421 = vector.broadcast %cst_90 : f32 to vector<8x16xf32>
    %422 = arith.maximumf %420, %421 : vector<8x16xf32>
    %423 = arith.mulf %422, %17 : vector<8x16xf32>
    %cst_91 = arith.constant dense<0.000000e+00> : vector<8xf32>
    %424 = vector.multi_reduction <add>, %423, %cst_91 [1] : vector<8x16xf32> to vector<8xf32>
    %425 = vector.shape_cast %424 : vector<8xf32> to vector<8x1xf32>
    %426 = arith.addf %425, %20 : vector<8x1xf32>
    %cst_92 = arith.constant 0.000000e+00 : f32
    %427 = vector.broadcast %cst_92 : f32 to vector<8x1xf32>
    %428 = arith.maximumf %426, %427 : vector<8x1xf32>
    %c0_93 = arith.constant 0 : index
    %c1 = arith.constant 1 : index
    %429 = vector.load %arg12[%c0_93, %c1] : memref<8x6xf32, #tpu.memory_space<vmem>>, vector<8x1xf32>
    tpu.vector_store %arg12[%c0_93, %c1], %428 {strides = array<i32>} : memref<8x6xf32, #tpu.memory_space<vmem>>, vector<8x1xf32>,
    %430 = vector.extract_strided_slice %32 {offsets = [16, 0], sizes = [8, 96], strides = [1, 1]} : vector<48x96xf32> to vector<8x96xf32>
    %431 = vector.broadcast %428 : vector<8x1xf32> to vector<8x96xf32>
    %432 = arith.mulf %431, %5 : vector<8x96xf32>
    %433 = arith.addf %430, %432 : vector<8x96xf32>
    %434 = vector.extract_strided_slice %433 {offsets = [0, 0], sizes = [8, 32], strides = [1, 1]} : vector<8x96xf32> to vector<8x32xf32>
    %435 = vector.extract_strided_slice %399 {offsets = [0, 0], sizes = [8, 32], strides = [1, 1]} : vector<8x96xf32> to vector<8x32xf32>
    %436 = arith.addf %434, %435 : vector<8x32xf32>
    %437 = arith.negf %436 : vector<8x32xf32>
    %438 = math.exp %437 : vector<8x32xf32>
    %cst_94 = arith.constant 1.000000e+00 : f32
    %439 = vector.broadcast %cst_94 : f32 to vector<8x32xf32>
    %440 = arith.addf %439, %438 : vector<8x32xf32>
    %441 = arith.divf %439, %440 : vector<8x32xf32>
    %442 = vector.extract_strided_slice %433 {offsets = [0, 32], sizes = [8, 32], strides = [1, 1]} : vector<8x96xf32> to vector<8x32xf32>
    %443 = vector.extract_strided_slice %399 {offsets = [0, 32], sizes = [8, 32], strides = [1, 1]} : vector<8x96xf32> to vector<8x32xf32>
    %444 = arith.addf %442, %443 : vector<8x32xf32>
    %445 = arith.negf %444 : vector<8x32xf32>
    %446 = math.exp %445 : vector<8x32xf32>
    %cst_95 = arith.constant 1.000000e+00 : f32
    %447 = vector.broadcast %cst_95 : f32 to vector<8x32xf32>
    %448 = arith.addf %447, %446 : vector<8x32xf32>
    %449 = arith.divf %447, %448 : vector<8x32xf32>
    %450 = vector.extract_strided_slice %433 {offsets = [0, 64], sizes = [8, 32], strides = [1, 1]} : vector<8x96xf32> to vector<8x32xf32>
    %451 = vector.extract_strided_slice %399 {offsets = [0, 64], sizes = [8, 32], strides = [1, 1]} : vector<8x96xf32> to vector<8x32xf32>
    %452 = arith.mulf %441, %451 : vector<8x32xf32>
    %453 = arith.addf %450, %452 : vector<8x32xf32>
    %454 = math.tanh %453 : vector<8x32xf32>
    %cst_96 = arith.constant 1.000000e+00 : f32
    %455 = vector.broadcast %cst_96 : f32 to vector<8x32xf32>
    %456 = arith.subf %455, %449 : vector<8x32xf32>
    %457 = arith.mulf %456, %454 : vector<8x32xf32>
    %458 = arith.mulf %449, %396 : vector<8x32xf32>
    %459 = arith.addf %457, %458 : vector<8x32xf32>
    %cst_97 = arith.constant dense<0.000000e+00> : vector<8x112xf32>
    %460 = tpu.matmul %459, %2, %cst_97 {dimension_numbers = #tpu.dot_dimension_numbers<[1], [0], [0], [1], [0, 0, 1, 1], [], []>} : vector<8x32xf32>, vector<32x112xf32>, vector<8x112xf32> -> vector<8x112xf32>
    %461 = arith.addf %460, %8 : vector<8x112xf32>
    %462 = vector.extract_strided_slice %461 {offsets = [0, 0], sizes = [8, 96], strides = [1, 1]} : vector<8x112xf32> to vector<8x96xf32>
    %463 = vector.extract_strided_slice %461 {offsets = [0, 96], sizes = [8, 16], strides = [1, 1]} : vector<8x112xf32> to vector<8x16xf32>
    %cst_98 = arith.constant dense<0.000000e+00> : vector<8xf32>
    %464 = vector.multi_reduction <add>, %463, %cst_98 [1] : vector<8x16xf32> to vector<8xf32>
    %465 = vector.shape_cast %464 : vector<8xf32> to vector<8x1xf32>
    %cst_99 = arith.constant 1.600000e+01 : f32
    %466 = vector.broadcast %cst_99 : f32 to vector<8x1xf32>
    %467 = arith.divf %465, %466 : vector<8x1xf32>
    %468 = vector.broadcast %467 : vector<8x1xf32> to vector<8x16xf32>
    %469 = arith.subf %463, %468 : vector<8x16xf32>
    %470 = arith.mulf %469, %469 : vector<8x16xf32>
    %cst_100 = arith.constant dense<0.000000e+00> : vector<8xf32>
    %471 = vector.multi_reduction <add>, %470, %cst_100 [1] : vector<8x16xf32> to vector<8xf32>
    %472 = vector.shape_cast %471 : vector<8xf32> to vector<8x1xf32>
    %cst_101 = arith.constant 1.600000e+01 : f32
    %473 = vector.broadcast %cst_101 : f32 to vector<8x1xf32>
    %474 = arith.divf %472, %473 : vector<8x1xf32>
    %475 = vector.broadcast %467 : vector<8x1xf32> to vector<8x16xf32>
    %476 = arith.subf %463, %475 : vector<8x16xf32>
    %cst_102 = arith.constant 9.99999974E-6 : f32
    %477 = vector.broadcast %cst_102 : f32 to vector<8x1xf32>
    %478 = arith.addf %474, %477 : vector<8x1xf32>
    %479 = math.rsqrt %478 : vector<8x1xf32>
    %480 = vector.broadcast %479 : vector<8x1xf32> to vector<8x16xf32>
    %481 = arith.mulf %476, %480 : vector<8x16xf32>
    %482 = arith.mulf %481, %11 : vector<8x16xf32>
    %483 = arith.addf %482, %14 : vector<8x16xf32>
    %cst_103 = arith.constant 0.000000e+00 : f32
    %484 = vector.broadcast %cst_103 : f32 to vector<8x16xf32>
    %485 = arith.maximumf %483, %484 : vector<8x16xf32>
    %486 = arith.mulf %485, %17 : vector<8x16xf32>
    %cst_104 = arith.constant dense<0.000000e+00> : vector<8xf32>
    %487 = vector.multi_reduction <add>, %486, %cst_104 [1] : vector<8x16xf32> to vector<8xf32>
    %488 = vector.shape_cast %487 : vector<8xf32> to vector<8x1xf32>
    %489 = arith.addf %488, %20 : vector<8x1xf32>
    %cst_105 = arith.constant 0.000000e+00 : f32
    %490 = vector.broadcast %cst_105 : f32 to vector<8x1xf32>
    %491 = arith.maximumf %489, %490 : vector<8x1xf32>
    %c0_106 = arith.constant 0 : index
    %c2 = arith.constant 2 : index
    %492 = vector.load %arg12[%c0_106, %c2] : memref<8x6xf32, #tpu.memory_space<vmem>>, vector<8x1xf32>
    tpu.vector_store %arg12[%c0_106, %c2], %491 {strides = array<i32>} : memref<8x6xf32, #tpu.memory_space<vmem>>, vector<8x1xf32>,
    %493 = vector.extract_strided_slice %32 {offsets = [24, 0], sizes = [8, 96], strides = [1, 1]} : vector<48x96xf32> to vector<8x96xf32>
    %494 = vector.broadcast %491 : vector<8x1xf32> to vector<8x96xf32>
    %495 = arith.mulf %494, %5 : vector<8x96xf32>
    %496 = arith.addf %493, %495 : vector<8x96xf32>
    %497 = vector.extract_strided_slice %496 {offsets = [0, 0], sizes = [8, 32], strides = [1, 1]} : vector<8x96xf32> to vector<8x32xf32>
    %498 = vector.extract_strided_slice %462 {offsets = [0, 0], sizes = [8, 32], strides = [1, 1]} : vector<8x96xf32> to vector<8x32xf32>
    %499 = arith.addf %497, %498 : vector<8x32xf32>
    %500 = arith.negf %499 : vector<8x32xf32>
    %501 = math.exp %500 : vector<8x32xf32>
    %cst_107 = arith.constant 1.000000e+00 : f32
    %502 = vector.broadcast %cst_107 : f32 to vector<8x32xf32>
    %503 = arith.addf %502, %501 : vector<8x32xf32>
    %504 = arith.divf %502, %503 : vector<8x32xf32>
    %505 = vector.extract_strided_slice %496 {offsets = [0, 32], sizes = [8, 32], strides = [1, 1]} : vector<8x96xf32> to vector<8x32xf32>
    %506 = vector.extract_strided_slice %462 {offsets = [0, 32], sizes = [8, 32], strides = [1, 1]} : vector<8x96xf32> to vector<8x32xf32>
    %507 = arith.addf %505, %506 : vector<8x32xf32>
    %508 = arith.negf %507 : vector<8x32xf32>
    %509 = math.exp %508 : vector<8x32xf32>
    %cst_108 = arith.constant 1.000000e+00 : f32
    %510 = vector.broadcast %cst_108 : f32 to vector<8x32xf32>
    %511 = arith.addf %510, %509 : vector<8x32xf32>
    %512 = arith.divf %510, %511 : vector<8x32xf32>
    %513 = vector.extract_strided_slice %496 {offsets = [0, 64], sizes = [8, 32], strides = [1, 1]} : vector<8x96xf32> to vector<8x32xf32>
    %514 = vector.extract_strided_slice %462 {offsets = [0, 64], sizes = [8, 32], strides = [1, 1]} : vector<8x96xf32> to vector<8x32xf32>
    %515 = arith.mulf %504, %514 : vector<8x32xf32>
    %516 = arith.addf %513, %515 : vector<8x32xf32>
    %517 = math.tanh %516 : vector<8x32xf32>
    %cst_109 = arith.constant 1.000000e+00 : f32
    %518 = vector.broadcast %cst_109 : f32 to vector<8x32xf32>
    %519 = arith.subf %518, %512 : vector<8x32xf32>
    %520 = arith.mulf %519, %517 : vector<8x32xf32>
    %521 = arith.mulf %512, %459 : vector<8x32xf32>
    %522 = arith.addf %520, %521 : vector<8x32xf32>
    %cst_110 = arith.constant dense<0.000000e+00> : vector<8x112xf32>
    %523 = tpu.matmul %522, %2, %cst_110 {dimension_numbers = #tpu.dot_dimension_numbers<[1], [0], [0], [1], [0, 0, 1, 1], [], []>} : vector<8x32xf32>, vector<32x112xf32>, vector<8x112xf32> -> vector<8x112xf32>
    %524 = arith.addf %523, %8 : vector<8x112xf32>
    %525 = vector.extract_strided_slice %524 {offsets = [0, 0], sizes = [8, 96], strides = [1, 1]} : vector<8x112xf32> to vector<8x96xf32>
    %526 = vector.extract_strided_slice %524 {offsets = [0, 96], sizes = [8, 16], strides = [1, 1]} : vector<8x112xf32> to vector<8x16xf32>
    %cst_111 = arith.constant dense<0.000000e+00> : vector<8xf32>
    %527 = vector.multi_reduction <add>, %526, %cst_111 [1] : vector<8x16xf32> to vector<8xf32>
    %528 = vector.shape_cast %527 : vector<8xf32> to vector<8x1xf32>
    %cst_112 = arith.constant 1.600000e+01 : f32
    %529 = vector.broadcast %cst_112 : f32 to vector<8x1xf32>
    %530 = arith.divf %528, %529 : vector<8x1xf32>
    %531 = vector.broadcast %530 : vector<8x1xf32> to vector<8x16xf32>
    %532 = arith.subf %526, %531 : vector<8x16xf32>
    %533 = arith.mulf %532, %532 : vector<8x16xf32>
    %cst_113 = arith.constant dense<0.000000e+00> : vector<8xf32>
    %534 = vector.multi_reduction <add>, %533, %cst_113 [1] : vector<8x16xf32> to vector<8xf32>
    %535 = vector.shape_cast %534 : vector<8xf32> to vector<8x1xf32>
    %cst_114 = arith.constant 1.600000e+01 : f32
    %536 = vector.broadcast %cst_114 : f32 to vector<8x1xf32>
    %537 = arith.divf %535, %536 : vector<8x1xf32>
    %538 = vector.broadcast %530 : vector<8x1xf32> to vector<8x16xf32>
    %539 = arith.subf %526, %538 : vector<8x16xf32>
    %cst_115 = arith.constant 9.99999974E-6 : f32
    %540 = vector.broadcast %cst_115 : f32 to vector<8x1xf32>
    %541 = arith.addf %537, %540 : vector<8x1xf32>
    %542 = math.rsqrt %541 : vector<8x1xf32>
    %543 = vector.broadcast %542 : vector<8x1xf32> to vector<8x16xf32>
    %544 = arith.mulf %539, %543 : vector<8x16xf32>
    %545 = arith.mulf %544, %11 : vector<8x16xf32>
    %546 = arith.addf %545, %14 : vector<8x16xf32>
    %cst_116 = arith.constant 0.000000e+00 : f32
    %547 = vector.broadcast %cst_116 : f32 to vector<8x16xf32>
    %548 = arith.maximumf %546, %547 : vector<8x16xf32>
    %549 = arith.mulf %548, %17 : vector<8x16xf32>
    %cst_117 = arith.constant dense<0.000000e+00> : vector<8xf32>
    %550 = vector.multi_reduction <add>, %549, %cst_117 [1] : vector<8x16xf32> to vector<8xf32>
    %551 = vector.shape_cast %550 : vector<8xf32> to vector<8x1xf32>
    %552 = arith.addf %551, %20 : vector<8x1xf32>
    %cst_118 = arith.constant 0.000000e+00 : f32
    %553 = vector.broadcast %cst_118 : f32 to vector<8x1xf32>
    %554 = arith.maximumf %552, %553 : vector<8x1xf32>
    %c0_119 = arith.constant 0 : index
    %c3 = arith.constant 3 : index
    %555 = vector.load %arg12[%c0_119, %c3] : memref<8x6xf32, #tpu.memory_space<vmem>>, vector<8x1xf32>
    tpu.vector_store %arg12[%c0_119, %c3], %554 {strides = array<i32>} : memref<8x6xf32, #tpu.memory_space<vmem>>, vector<8x1xf32>,
    %556 = vector.extract_strided_slice %32 {offsets = [32, 0], sizes = [8, 96], strides = [1, 1]} : vector<48x96xf32> to vector<8x96xf32>
    %557 = vector.broadcast %554 : vector<8x1xf32> to vector<8x96xf32>
    %558 = arith.mulf %557, %5 : vector<8x96xf32>
    %559 = arith.addf %556, %558 : vector<8x96xf32>
    %560 = vector.extract_strided_slice %559 {offsets = [0, 0], sizes = [8, 32], strides = [1, 1]} : vector<8x96xf32> to vector<8x32xf32>
    %561 = vector.extract_strided_slice %525 {offsets = [0, 0], sizes = [8, 32], strides = [1, 1]} : vector<8x96xf32> to vector<8x32xf32>
    %562 = arith.addf %560, %561 : vector<8x32xf32>
    %563 = arith.negf %562 : vector<8x32xf32>
    %564 = math.exp %563 : vector<8x32xf32>
    %cst_120 = arith.constant 1.000000e+00 : f32
    %565 = vector.broadcast %cst_120 : f32 to vector<8x32xf32>
    %566 = arith.addf %565, %564 : vector<8x32xf32>
    %567 = arith.divf %565, %566 : vector<8x32xf32>
    %568 = vector.extract_strided_slice %559 {offsets = [0, 32], sizes = [8, 32], strides = [1, 1]} : vector<8x96xf32> to vector<8x32xf32>
    %569 = vector.extract_strided_slice %525 {offsets = [0, 32], sizes = [8, 32], strides = [1, 1]} : vector<8x96xf32> to vector<8x32xf32>
    %570 = arith.addf %568, %569 : vector<8x32xf32>
    %571 = arith.negf %570 : vector<8x32xf32>
    %572 = math.exp %571 : vector<8x32xf32>
    %cst_121 = arith.constant 1.000000e+00 : f32
    %573 = vector.broadcast %cst_121 : f32 to vector<8x32xf32>
    %574 = arith.addf %573, %572 : vector<8x32xf32>
    %575 = arith.divf %573, %574 : vector<8x32xf32>
    %576 = vector.extract_strided_slice %559 {offsets = [0, 64], sizes = [8, 32], strides = [1, 1]} : vector<8x96xf32> to vector<8x32xf32>
    %577 = vector.extract_strided_slice %525 {offsets = [0, 64], sizes = [8, 32], strides = [1, 1]} : vector<8x96xf32> to vector<8x32xf32>
    %578 = arith.mulf %567, %577 : vector<8x32xf32>
    %579 = arith.addf %576, %578 : vector<8x32xf32>
    %580 = math.tanh %579 : vector<8x32xf32>
    %cst_122 = arith.constant 1.000000e+00 : f32
    %581 = vector.broadcast %cst_122 : f32 to vector<8x32xf32>
    %582 = arith.subf %581, %575 : vector<8x32xf32>
    %583 = arith.mulf %582, %580 : vector<8x32xf32>
    %584 = arith.mulf %575, %522 : vector<8x32xf32>
    %585 = arith.addf %583, %584 : vector<8x32xf32>
    %cst_123 = arith.constant dense<0.000000e+00> : vector<8x112xf32>
    %586 = tpu.matmul %585, %2, %cst_123 {dimension_numbers = #tpu.dot_dimension_numbers<[1], [0], [0], [1], [0, 0, 1, 1], [], []>} : vector<8x32xf32>, vector<32x112xf32>, vector<8x112xf32> -> vector<8x112xf32>
    %587 = arith.addf %586, %8 : vector<8x112xf32>
    %588 = vector.extract_strided_slice %587 {offsets = [0, 0], sizes = [8, 96], strides = [1, 1]} : vector<8x112xf32> to vector<8x96xf32>
    %589 = vector.extract_strided_slice %587 {offsets = [0, 96], sizes = [8, 16], strides = [1, 1]} : vector<8x112xf32> to vector<8x16xf32>
    %cst_124 = arith.constant dense<0.000000e+00> : vector<8xf32>
    %590 = vector.multi_reduction <add>, %589, %cst_124 [1] : vector<8x16xf32> to vector<8xf32>
    %591 = vector.shape_cast %590 : vector<8xf32> to vector<8x1xf32>
    %cst_125 = arith.constant 1.600000e+01 : f32
    %592 = vector.broadcast %cst_125 : f32 to vector<8x1xf32>
    %593 = arith.divf %591, %592 : vector<8x1xf32>
    %594 = vector.broadcast %593 : vector<8x1xf32> to vector<8x16xf32>
    %595 = arith.subf %589, %594 : vector<8x16xf32>
    %596 = arith.mulf %595, %595 : vector<8x16xf32>
    %cst_126 = arith.constant dense<0.000000e+00> : vector<8xf32>
    %597 = vector.multi_reduction <add>, %596, %cst_126 [1] : vector<8x16xf32> to vector<8xf32>
    %598 = vector.shape_cast %597 : vector<8xf32> to vector<8x1xf32>
    %cst_127 = arith.constant 1.600000e+01 : f32
    %599 = vector.broadcast %cst_127 : f32 to vector<8x1xf32>
    %600 = arith.divf %598, %599 : vector<8x1xf32>
    %601 = vector.broadcast %593 : vector<8x1xf32> to vector<8x16xf32>
    %602 = arith.subf %589, %601 : vector<8x16xf32>
    %cst_128 = arith.constant 9.99999974E-6 : f32
    %603 = vector.broadcast %cst_128 : f32 to vector<8x1xf32>
    %604 = arith.addf %600, %603 : vector<8x1xf32>
    %605 = math.rsqrt %604 : vector<8x1xf32>
    %606 = vector.broadcast %605 : vector<8x1xf32> to vector<8x16xf32>
    %607 = arith.mulf %602, %606 : vector<8x16xf32>
    %608 = arith.mulf %607, %11 : vector<8x16xf32>
    %609 = arith.addf %608, %14 : vector<8x16xf32>
    %cst_129 = arith.constant 0.000000e+00 : f32
    %610 = vector.broadcast %cst_129 : f32 to vector<8x16xf32>
    %611 = arith.maximumf %609, %610 : vector<8x16xf32>
    %612 = arith.mulf %611, %17 : vector<8x16xf32>
    %cst_130 = arith.constant dense<0.000000e+00> : vector<8xf32>
    %613 = vector.multi_reduction <add>, %612, %cst_130 [1] : vector<8x16xf32> to vector<8xf32>
    %614 = vector.shape_cast %613 : vector<8xf32> to vector<8x1xf32>
    %615 = arith.addf %614, %20 : vector<8x1xf32>
    %cst_131 = arith.constant 0.000000e+00 : f32
    %616 = vector.broadcast %cst_131 : f32 to vector<8x1xf32>
    %617 = arith.maximumf %615, %616 : vector<8x1xf32>
    %c0_132 = arith.constant 0 : index
    %c4 = arith.constant 4 : index
    %618 = vector.load %arg12[%c0_132, %c4] : memref<8x6xf32, #tpu.memory_space<vmem>>, vector<8x1xf32>
    tpu.vector_store %arg12[%c0_132, %c4], %617 {strides = array<i32>} : memref<8x6xf32, #tpu.memory_space<vmem>>, vector<8x1xf32>,
    %619 = vector.extract_strided_slice %32 {offsets = [40, 0], sizes = [8, 96], strides = [1, 1]} : vector<48x96xf32> to vector<8x96xf32>
    %620 = vector.broadcast %617 : vector<8x1xf32> to vector<8x96xf32>
    %621 = arith.mulf %620, %5 : vector<8x96xf32>
    %622 = arith.addf %619, %621 : vector<8x96xf32>
    %623 = vector.extract_strided_slice %622 {offsets = [0, 0], sizes = [8, 32], strides = [1, 1]} : vector<8x96xf32> to vector<8x32xf32>
    %624 = vector.extract_strided_slice %588 {offsets = [0, 0], sizes = [8, 32], strides = [1, 1]} : vector<8x96xf32> to vector<8x32xf32>
    %625 = arith.addf %623, %624 : vector<8x32xf32>
    %626 = arith.negf %625 : vector<8x32xf32>
    %627 = math.exp %626 : vector<8x32xf32>
    %cst_133 = arith.constant 1.000000e+00 : f32
    %628 = vector.broadcast %cst_133 : f32 to vector<8x32xf32>
    %629 = arith.addf %628, %627 : vector<8x32xf32>
    %630 = arith.divf %628, %629 : vector<8x32xf32>
    %631 = vector.extract_strided_slice %622 {offsets = [0, 32], sizes = [8, 32], strides = [1, 1]} : vector<8x96xf32> to vector<8x32xf32>
    %632 = vector.extract_strided_slice %588 {offsets = [0, 32], sizes = [8, 32], strides = [1, 1]} : vector<8x96xf32> to vector<8x32xf32>
    %633 = arith.addf %631, %632 : vector<8x32xf32>
    %634 = arith.negf %633 : vector<8x32xf32>
    %635 = math.exp %634 : vector<8x32xf32>
    %cst_134 = arith.constant 1.000000e+00 : f32
    %636 = vector.broadcast %cst_134 : f32 to vector<8x32xf32>
    %637 = arith.addf %636, %635 : vector<8x32xf32>
    %638 = arith.divf %636, %637 : vector<8x32xf32>
    %639 = vector.extract_strided_slice %622 {offsets = [0, 64], sizes = [8, 32], strides = [1, 1]} : vector<8x96xf32> to vector<8x32xf32>
    %640 = vector.extract_strided_slice %588 {offsets = [0, 64], sizes = [8, 32], strides = [1, 1]} : vector<8x96xf32> to vector<8x32xf32>
    %641 = arith.mulf %630, %640 : vector<8x32xf32>
    %642 = arith.addf %639, %641 : vector<8x32xf32>
    %643 = math.tanh %642 : vector<8x32xf32>
    %cst_135 = arith.constant 1.000000e+00 : f32
    %644 = vector.broadcast %cst_135 : f32 to vector<8x32xf32>
    %645 = arith.subf %644, %638 : vector<8x32xf32>
    %646 = arith.mulf %645, %643 : vector<8x32xf32>
    %647 = arith.mulf %638, %585 : vector<8x32xf32>
    %648 = arith.addf %646, %647 : vector<8x32xf32>
    %cst_136 = arith.constant dense<0.000000e+00> : vector<8x112xf32>
    %649 = tpu.matmul %648, %2, %cst_136 {dimension_numbers = #tpu.dot_dimension_numbers<[1], [0], [0], [1], [0, 0, 1, 1], [], []>} : vector<8x32xf32>, vector<32x112xf32>, vector<8x112xf32> -> vector<8x112xf32>
    %650 = arith.addf %649, %8 : vector<8x112xf32>
    %651 = vector.extract_strided_slice %650 {offsets = [0, 96], sizes = [8, 16], strides = [1, 1]} : vector<8x112xf32> to vector<8x16xf32>
    %cst_137 = arith.constant dense<0.000000e+00> : vector<8xf32>
    %652 = vector.multi_reduction <add>, %651, %cst_137 [1] : vector<8x16xf32> to vector<8xf32>
    %653 = vector.shape_cast %652 : vector<8xf32> to vector<8x1xf32>
    %cst_138 = arith.constant 1.600000e+01 : f32
    %654 = vector.broadcast %cst_138 : f32 to vector<8x1xf32>
    %655 = arith.divf %653, %654 : vector<8x1xf32>
    %656 = vector.broadcast %655 : vector<8x1xf32> to vector<8x16xf32>
    %657 = arith.subf %651, %656 : vector<8x16xf32>
    %658 = arith.mulf %657, %657 : vector<8x16xf32>
    %cst_139 = arith.constant dense<0.000000e+00> : vector<8xf32>
    %659 = vector.multi_reduction <add>, %658, %cst_139 [1] : vector<8x16xf32> to vector<8xf32>
    %660 = vector.shape_cast %659 : vector<8xf32> to vector<8x1xf32>
    %cst_140 = arith.constant 1.600000e+01 : f32
    %661 = vector.broadcast %cst_140 : f32 to vector<8x1xf32>
    %662 = arith.divf %660, %661 : vector<8x1xf32>
    %663 = vector.broadcast %655 : vector<8x1xf32> to vector<8x16xf32>
    %664 = arith.subf %651, %663 : vector<8x16xf32>
    %cst_141 = arith.constant 9.99999974E-6 : f32
    %665 = vector.broadcast %cst_141 : f32 to vector<8x1xf32>
    %666 = arith.addf %662, %665 : vector<8x1xf32>
    %667 = math.rsqrt %666 : vector<8x1xf32>
    %668 = vector.broadcast %667 : vector<8x1xf32> to vector<8x16xf32>
    %669 = arith.mulf %664, %668 : vector<8x16xf32>
    %670 = arith.mulf %669, %11 : vector<8x16xf32>
    %671 = arith.addf %670, %14 : vector<8x16xf32>
    %cst_142 = arith.constant 0.000000e+00 : f32
    %672 = vector.broadcast %cst_142 : f32 to vector<8x16xf32>
    %673 = arith.maximumf %671, %672 : vector<8x16xf32>
    %674 = arith.mulf %673, %17 : vector<8x16xf32>
    %cst_143 = arith.constant dense<0.000000e+00> : vector<8xf32>
    %675 = vector.multi_reduction <add>, %674, %cst_143 [1] : vector<8x16xf32> to vector<8xf32>
    %676 = vector.shape_cast %675 : vector<8xf32> to vector<8x1xf32>
    %677 = arith.addf %676, %20 : vector<8x1xf32>
    %cst_144 = arith.constant 0.000000e+00 : f32
    %678 = vector.broadcast %cst_144 : f32 to vector<8x1xf32>
    %679 = arith.maximumf %677, %678 : vector<8x1xf32>
    %c0_145 = arith.constant 0 : index
    %c5 = arith.constant 5 : index
    %680 = vector.load %arg12[%c0_145, %c5] : memref<8x6xf32, #tpu.memory_space<vmem>>, vector<8x1xf32>
    tpu.vector_store %arg12[%c0_145, %c5], %679 {strides = array<i32>} : memref<8x6xf32, #tpu.memory_space<vmem>>, vector<8x1xf32>,
    return
  }
}

</mosaic_0001>

<bundles_post_ra>
// kernel: simple_occ_gru_forward.1
= control target key start
LH: loop header
LB: loop body
LE: loop exit
PB: predicated region body
PF: predicated region fallthrough
CT: control target
= control target key end

     0   :  { %s3192_s0 = inlined_call_operand.vmem [shape: f32[64,4], index: 0, kind: input, shape index: {}]   ;;  %s3193_s1 = inlined_call_operand.vmem [shape: f32[48,3], index: 1, kind: input, shape index: {}]   ;;  %s3194_s2 = inlined_call_operand.vmem [shape: f32[4,96], index: 2, kind: input, shape index: {}]   ;;  %s3195_s3 = inlined_call_operand.vmem [shape: f32[1,96], index: 3, kind: input, shape index: {}]   ;;  %s3196_s4 = inlined_call_operand.vmem [shape: f32[3,96], index: 4, kind: input, shape index: {}]   ;;  %s3197_s5 = inlined_call_operand.vmem [shape: f32[1,96], index: 5, kind: input, shape index: {}]   ;;  %s3198_s6 = inlined_call_operand.vmem [shape: f32[32,112], index: 6, kind: input, shape index: {}]   ;;  %s3199_s7 = inlined_call_operand.vmem [shape: f32[1,112], index: 7, kind: input, shape index: {}]   ;;  %s3200_s8 = inlined_call_operand.vmem [shape: f32[1,16], index: 8, kind: input, shape index: {}]   ;;  %s3201_s9 = inlined_call_operand.vmem [shape: f32[1,16], index: 9, kind: input, shape index: {}]   ;;  %s3202_s10 = inlined_call_operand.vmem [shape: f32[1,16], index: 10, kind: input, shape index: {}]   ;;  %s3203_s11 = inlined_call_operand.<no memory space> [shape: f32[1,1], index: 11, kind: input, shape index: {}]   ;;  %s3204_s12 = inlined_call_operand.hbm [shape: f32[8,6], index: 12, kind: output, shape index: {}]  }
   0x1   :  { %v17_v0 = vstv %s3203_s11 }
   0x2   :  { %18 = vst [vmem:[#allocation2] sm:$0x1] %v17_v0 }
   0x3   :  { %v44_v1 = vld [vmem:[%s3194_s2] sm:$0xf]  ;;  %vm129_vm0 = vcmask 1043456   ;;  %vm104_vm1 = vcmask 31744   ;;  %v97_v3 = vld [vmem:[%s3192_s0 + $0x8] sm:$0xff] }
   0x4   :  { %v96_v2 = vld [vmem:[%s3192_s0] sm:$0xff]  ;;  %2240 = vmatprep.subr.msk.mxu0 %vm129_vm0, %v44_v1 }
   0x5   :  { %2242 = vmatprep.mubr.msk.f32.mxu0 %vm104_vm1, %v96_v2  ;;  %v2736_v4 = vld [vmem:[%s3199_s7] ss:$0 sm:$0xff] }
   0x6   :  { %19 = vsyncpa [#allocation4], 0  ;;  %2241 = vmatpush3.msk.msra.mxu0 %vm129_vm0, %v44_v1  ;;  %s2642_s2 = smov 64   ;;  %v2744_v5 = vld [vmem:[%s3197_s5] ss:$0 sm:$0xff]  ;;  %vm263_vm2 = vcmask 1042432  }
   0x7   :  { %369 = vrot.lane.b32.xlu0 %v2736_v4, %s2642_s2  ;;  %2243 = vmatmul.mubr.msk.f32.vlgmr.msra.gmra.mrb[0].mxu0 %vm104_vm1, %v97_v3  ;;  %v45_v18 = vld [vmem:[%s3196_s4] sm:$0x7]  ;;  %vm244_vm3 = vcmask 23552   ;;  %v239_v20 = vld [vmem:[%s3193_s1 + $0x8] sm:$0xff]  ;;  %v240_v23 = vld [vmem:[%s3193_s1 + $0x10] sm:$0xff]  ;;  %v2643_v26 = vmov 0.0|0.0  }
   0x8   :  { %v238_v19 = vld [vmem:[%s3193_s1] sm:$0xff]  ;;  %2254 = vmatprep.subr.msk.mxu1 %vm263_vm2, %v45_v18  ;;  %v47_v22 = vld [vmem:[%s3198_s6 + $0x8] sm:$0xff]  ;;  %v48_v25 = vld [vmem:[%s3198_s6 + $0x10] sm:$0xff]  ;;  %2425 = vmatprep.subr.bf16.mxu0 %v2643_v26  ;;  %s2644_s15 = smov 96   ;;  %vm2645_vm4 = vmmov 0   ;;  %v2646_v33 = vmov 0.0  }
   0x9   :  { %2256 = vmatprep.mubr.msk.f32.mxu1 %vm244_vm3, %v238_v19  ;;  %v46_v21 = vld [vmem:[%s3198_s6] sm:$0xff]  ;;  %2255 = vmatpush3.msk.msra.mxu1 %vm263_vm2, %v45_v18  ;;  %v49_v27 = vld [vmem:[%s3198_s6 + $0x18] sm:$0xff]  ;;  %v243_v32 = vld [vmem:[%s3193_s1 + $0x28] sm:$0xff]  ;;  %vm390_vm5 = vcmask 261120   ;;  %vm1174_vm6 = vcmask 130048   ;;  %vm1356_vm7 = vcmask 7168  }
   0xa   :  { %v2770_v24 = vpack.c.bf16 %v47_v22, %v46_v21  ;;  %2257 = vmatmul.mubr.msk.f32.vlgmr.msra.gmra.mrb[0].mxu1 %vm244_vm3, %v239_v20  ;;  %2419 = vmatprep.subr.bf16.mxu1 %v2643_v26  ;;  %v241_v28 = vld [vmem:[%s3193_s1 + $0x18] sm:$0xff]  ;;  %v2786_v29 = vpack.c.bf16 %v49_v27, %v48_v25  ;;  %v242_v30 = vld [vmem:[%s3193_s1 + $0x20] sm:$0xff]  ;;  %v98_v59 = vld [vmem:[%s3192_s0 + $0x10] sm:$0xff]  ;;  %s2651_s6 = smov 4   ;;  %s2652_s14 = smov 1   ;;  %vm1503_vm8 = vcmask 15368  }
   0xb   :  { %2259 = vmatprep.mubr.msk.f32.mxu1 %vm244_vm3, %v240_v23  ;;  %v99_v60 = vld [vmem:[%s3192_s0 + $0x18] sm:$0xff]  ;;  %v100_v61 = vld [vmem:[%s3192_s0 + $0x20] sm:$0xff]  ;;  %2245 = vmatprep.mubr.msk.f32.mxu0 %vm104_vm1, %v98_v59  ;;  %v101_v62 = vld [vmem:[%s3192_s0 + $0x28] sm:$0xff]  ;;  %vm1649_vm9 = vcmask 23568   ;;  %vm1795_vm10 = vcmask 31768   ;;  %vm1941_vm11 = vcmask 39968  }
   0xc   :  { %2421 = vmatpush3.bf16.msra.mxu1 %v2770_v24  ;;  %2427 = vmatpush3.bf16.msra.mxu0 %v2770_v24  ;;  %v102_v63 = vld [vmem:[%s3192_s0 + $0x30] sm:$0xff]  ;;  %v103_v0 = vld [vmem:[%s3192_s0 + $0x38] sm:$0xff]  ;;  %s2647_s0 = smov 32   ;;  %s2654_s1 = smov [#allocation3]   ;;  %vm2087_vm12 = vcmask 48168  }
   0xd   :  { %2422 = vmatprep.subr.bf16.mxu1 %v2643_v26  ;;  %2428 = vmatprep.subr.bf16.mxu0 %v2643_v26  ;;  %s2095_s16 = sshll.u32 %s2654_s1, 4  ;;  %s2096_s16 = int_to_ptr.vmem [resolvable:$true] %s2095_s16 }
   0xe   :  { %2260 = vmatmul.mubr.msk.f32.gmra.mrb[2].mxu1 %vm244_vm3, %v241_v28  ;;  %2246 = vmatmul.mubr.msk.f32.gmra.mrb[2].mxu0 %vm104_vm1, %v99_v60  ;;  %s2618_s17 = scalar_lea.vmem %s2096_s16, 128  ;;  %p2623_p1 = scmp.lt.s32.totalorder %s2096_s16, %s2096_s16 }
   0xf   :  { %2262 = vmatprep.mubr.msk.f32.mxu1 %vm244_vm3, %v242_v30  ;;  %2248 = vmatprep.mubr.msk.f32.mxu0 %vm104_vm1, %v100_v61  ;;  %p2619_p0 = scmp.ne.s32.totalorder %s2096_s16, %s2618_s17  ;;  %p2624_p2 = scmp.lt.s32.totalorder %s2618_s17, %s2618_s17 }
  0x10   :  { %2424 = vmatpush3.bf16.msra.mxu1 %v2786_v29  ;;  %2430 = vmatpush3.bf16.msra.mxu0 %v2786_v29 }
  0x11   :  { %2431 = vmatprep.subr.bf16.mxu1 %v2643_v26  ;;  %2437 = vmatprep.subr.bf16.mxu0 %v2643_v26  ;;  %p2625_p3 = por %p2624_p2, %p2623_p1 }
  0x12   :  { %2263 = vmatmul.mubr.msk.f32.gmra.mrb[4].mxu1 %vm244_vm3, %v243_v32  ;;  %2249 = vmatmul.mubr.msk.f32.gmra.mrb[4].mxu0 %vm104_vm1, %v101_v62 }
  0x13   :  { %2273 = vmatprep.mubr.msk.f32.mxu1 %vm2645_vm4, %v2646_v33  ;;  %2251 = vmatprep.mubr.msk.f32.mxu0 %vm104_vm1, %v102_v63  ;;  %p2626_p4 = pnand %p2625_p3, %p2619_p0 }
  0x16   :  { %2252 = vmatmul.mubr.msk.f32.gmra.mrb[6].mxu0 %vm104_vm1, %v103_v0 }
  0x17   :  { %2284 = vmatprep.mubr.msk.f32.mxu0 %vm2645_vm4, %v2646_v33 }
  0x79   :  { %v370_v13 = vpop.permute.xlu0 %369 }
  0xda   :  { %v2746_v6 = vpop.f32.mrb[0].mxu0 }
  0xdb   :  { %v199_v7 = vpop.f32.mrb[1].mxu0  ;;  %v205_v49 = vadd.f32 %v2746_v6, %v2744_v5 }
  0xdc   :  { %v200_v8 = vadd.f32 %v2744_v5, %v199_v7 }
  0xdd   :  { %v2808_v39 = vpop.f32.mrb[0].mxu1 }
  0xde   :  { %v362_v9 = vadd.f32 %v2736_v4, %v200_v8  ;;  %v2810_v40 = vpop.f32.mrb[1].mxu1 }
  0xe0   :  { %v2126_v10 = vmul.f32 -1.442695, %v362_v9 }
  0xe1   :  { %v2812_v41 = vpop.f32.mrb[2].mxu1  ;;  %v2247_v9 = vpop.f32.mrb[2].mxu0 }
  0xe2   :  { %2518 = vpow2.f32 %v2126_v10  ;;  %v2814_v42 = vpop.f32.mrb[3].mxu1  ;;  %v209_v10 = vpop.f32.mrb[3].mxu0 }
  0xe3   :  { %v210_v19 = vadd.f32 %v2744_v5, %v209_v10 }
  0xe5   :  { %v2816_v43 = vpop.f32.mrb[4].mxu1 }
  0xe6   :  { %v2818_v44 = vpop.f32.mrb[5].mxu1 }
  0xec   :  { %v2519_v11 = vpop.eup %2518 }
  0xed   :  { %v366_v12 = vadd.f32 1.0, %v2519_v11  ;;  %v2860_v11 = vpop.f32.mrb[4].mxu0 }
  0xef   :  { %2520 = vrcp.f32 %v366_v12  ;;  %v2862_v12 = vpop.f32.mrb[5].mxu0 }
  0xf9   :  { %v2521_v14 = vpop.eup %2520 }
  0xfa   :  { %v372_v15 = vmul.f32 %v2521_v14, %v370_v13  ;;  %v379_v34 = vsub.f32 1.0, %v2521_v14  ;;  %v385_v36 = vmul.f32 0.0, %v2521_v14  ;;  %v2864_v13 = vpop.f32.mrb[6].mxu0 }
  0xfb   :  { %v2866_v14 = vpop.f32.mrb[7].mxu0 }
  0xfc   :  { %374 = vrot.lane.b32.xlu0 %v372_v15, %s2642_s2 }
 0x16e   :  { %v375_v16 = vpop.permute.xlu0 %374 }
 0x16f   :  { %v377_v17 = vadd.f32 %v375_v16, %v200_v8 }
 0x171   :  { %2522 = vtanh.f32 %v377_v17 }
 0x17b   :  { %v2523_v31 = vpop.eup %2522 }
 0x17c   :  { %381 = vrot.lane.b32.xlu1 %v2523_v31, %s2644_s15 }
 0x1ee   :  { %v382_v35 = vpop.permute.xlu1 %381 }
 0x1ef   :  { %v384_v37 = vmul.f32 %v382_v35, %v379_v34 }
 0x1f1   :  { %v386_v38 = vadd.f32 %v385_v36, %v384_v37 }
 0x1f3   :  { %388 = vrot.lane.b32.xlu1 %v386_v38, %s2644_s15 }
 0x265   :  { %v389_v45 = vpop.permute.xlu1 %388 }
 0x266   :  { %2274 = vmatmul.mubr.msk.f32.vlgmr.msra.gmra.mrb[6].mxu1 %vm390_vm5, %v389_v45 }
 0x267   :  { %2433 = vmatpush3.bf16.msra.mxu1 %v2770_v24  ;;  %2295 = vmatprep.mubr.msk.f32.mxu1 %vm2645_vm4, %v2646_v33 }
 0x268   :  { %2434 = vmatprep.subr.bf16.mxu1 %v2643_v26 }
 0x26b   :  { %2436 = vmatpush3.bf16.msra.mxu1 %v2786_v29 }
 0x26c   :  { %2443 = vmatprep.subr.bf16.mxu1 %v2643_v26 }
 0x339   :  { %v459_v46 = vpop.f32.mrb[6].mxu1 }
 0x33a   :  { %v460_v47 = vadd.f32 %v2736_v4, %v459_v46  ;;  %v2275_v48 = vpop.f32.mrb[7].mxu1 }
 0x33c   :  { %471 = vrot.lane.b32.xlu0 %v460_v47, %s2642_s2  ;;  %v463_v50 = vadd.f32 %v460_v47, %v205_v49 }
 0x33e   :  { %v2128_v51 = vmul.f32 -1.442695, %v463_v50 }
 0x340   :  { %2524 = vpow2.f32 %v2128_v51 }
 0x34a   :  { %v2525_v52 = vpop.eup %2524 }
 0x34b   :  { %v467_v53 = vadd.f32 1.0, %v2525_v52 }
 0x34d   :  { %2526 = vrcp.f32 %v467_v53 }
 0x357   :  { %v2527_v54 = vpop.eup %2526 }
 0x358   :  { %v481_v2 = vsub.f32 1.0, %v2527_v54  ;;  %v487_v6 = vmul.f32 %v2527_v54, %v386_v38 }
 0x3ae   :  { %v472_v55 = vpop.permute.xlu0 %471 }
 0x3af   :  { %v474_v56 = vmul.f32 %v2527_v54, %v472_v55 }
 0x3b1   :  { %476 = vrot.lane.b32.xlu1 %v474_v56, %s2642_s2 }
 0x423   :  { %v477_v57 = vpop.permute.xlu1 %476 }
 0x424   :  { %v479_v58 = vadd.f32 %v477_v57, %v205_v49  ;;  %v215_v49 = vadd.f32 %v2247_v9, %v2744_v5 }
 0x426   :  { %2528 = vtanh.f32 %v479_v58 }
 0x430   :  { %v2529_v1 = vpop.eup %2528 }
 0x431   :  { %483 = vrot.lane.b32.xlu0 %v2529_v1, %s2644_s15 }
 0x4a3   :  { %v484_v3 = vpop.permute.xlu0 %483 }
 0x4a4   :  { %v486_v7 = vmul.f32 %v484_v3, %v481_v2 }
 0x4a6   :  { %v488_v8 = vadd.f32 %v487_v6, %v486_v7  ;;  %v220_v7 = vadd.f32 %v2744_v5, %v2862_v12 }
 0x4a8   :  { %490 = vrot.lane.b32.xlu1 %v488_v8, %s2644_s15 }
 0x51a   :  { %v491_v15 = vpop.permute.xlu1 %490 }
 0x51b   :  { %2285 = vmatmul.mubr.msk.f32.vlgmr.msra.gmra.mrb[8].mxu0 %vm390_vm5, %v491_v15 }
 0x51c   :  { %2439 = vmatpush3.bf16.msra.mxu0 %v2770_v24  ;;  %2306 = vmatprep.mubr.msk.f32.mxu0 %vm2645_vm4, %v2646_v33 }
 0x51d   :  { %2440 = vmatprep.subr.bf16.mxu0 %v2643_v26 }
 0x520   :  { %2442 = vmatpush3.bf16.msra.mxu0 %v2786_v29 }
 0x521   :  { %2449 = vmatprep.subr.bf16.mxu0 %v2643_v26 }
 0x5ee   :  { %v560_v16 = vpop.f32.mrb[8].mxu0 }
 0x5ef   :  { %v561_v17 = vadd.f32 %v2736_v4, %v560_v16  ;;  %v2286_v18 = vpop.f32.mrb[9].mxu0 }
 0x5f1   :  { %572 = vrot.lane.b32.xlu0 %v561_v17, %s2642_s2  ;;  %v564_v20 = vadd.f32 %v561_v17, %v210_v19 }
 0x5f3   :  { %v2130_v21 = vmul.f32 -1.442695, %v564_v20 }
 0x5f5   :  { %2530 = vpow2.f32 %v2130_v21 }
 0x5ff   :  { %v2531_v22 = vpop.eup %2530 }
 0x600   :  { %v568_v23 = vadd.f32 1.0, %v2531_v22 }
 0x602   :  { %2532 = vrcp.f32 %v568_v23 }
 0x60c   :  { %v2533_v25 = vpop.eup %2532 }
 0x60d   :  { %v582_v34 = vsub.f32 1.0, %v2533_v25  ;;  %v588_v36 = vmul.f32 %v2533_v25, %v488_v8 }
 0x663   :  { %v573_v27 = vpop.permute.xlu0 %572 }
 0x664   :  { %v575_v28 = vmul.f32 %v2533_v25, %v573_v27 }
 0x666   :  { %577 = vrot.lane.b32.xlu1 %v575_v28, %s2642_s2 }
 0x6d8   :  { %v578_v30 = vpop.permute.xlu1 %577 }
 0x6d9   :  { %v580_v31 = vadd.f32 %v578_v30, %v210_v19 }
 0x6db   :  { %2534 = vtanh.f32 %v580_v31 }
 0x6e5   :  { %v2535_v32 = vpop.eup %2534 }
 0x6e6   :  { %584 = vrot.lane.b32.xlu0 %v2535_v32, %s2644_s15 }
 0x758   :  { %v585_v35 = vpop.permute.xlu0 %584 }
 0x759   :  { %v587_v37 = vmul.f32 %v585_v35, %v582_v34  ;;  %v225_v34 = vadd.f32 %v2860_v11, %v2744_v5 }
 0x75b   :  { %v589_v38 = vadd.f32 %v588_v36, %v587_v37 }
 0x75d   :  { %591 = vrot.lane.b32.xlu1 %v589_v38, %s2644_s15 }
 0x7cf   :  { %v592_v45 = vpop.permute.xlu1 %591 }
 0x7d0   :  { %2296 = vmatmul.mubr.msk.f32.vlgmr.msra.gmra.mrb[8].mxu1 %vm390_vm5, %v592_v45 }
 0x7d1   :  { %2445 = vmatpush3.bf16.msra.mxu1 %v2770_v24  ;;  %2317 = vmatprep.mubr.msk.f32.mxu1 %vm2645_vm4, %v2646_v33 }
 0x7d2   :  { %2446 = vmatprep.subr.bf16.mxu1 %v2643_v26 }
 0x7d5   :  { %2448 = vmatpush3.bf16.msra.mxu1 %v2786_v29 }
 0x7d6   :  { %2455 = vmatprep.subr.bf16.mxu1 %v2643_v26 }
 0x8a3   :  { %v661_v46 = vpop.f32.mrb[8].mxu1 }
 0x8a4   :  { %v662_v47 = vadd.f32 %v2736_v4, %v661_v46  ;;  %v2297_v48 = vpop.f32.mrb[9].mxu1 }
 0x8a6   :  { %673 = vrot.lane.b32.xlu0 %v662_v47, %s2642_s2  ;;  %v665_v50 = vadd.f32 %v662_v47, %v215_v49 }
 0x8a8   :  { %v2132_v51 = vmul.f32 -1.442695, %v665_v50 }
 0x8aa   :  { %2536 = vpow2.f32 %v2132_v51 }
 0x8b4   :  { %v2537_v52 = vpop.eup %2536 }
 0x8b5   :  { %v669_v53 = vadd.f32 1.0, %v2537_v52 }
 0x8b7   :  { %2538 = vrcp.f32 %v669_v53 }
 0x8c1   :  { %v2539_v54 = vpop.eup %2538 }
 0x8c2   :  { %v683_v60 = vsub.f32 1.0, %v2539_v54  ;;  %v689_v62 = vmul.f32 %v2539_v54, %v589_v38 }
 0x918   :  { %v674_v55 = vpop.permute.xlu0 %673 }
 0x919   :  { %v676_v56 = vmul.f32 %v2539_v54, %v674_v55 }
 0x91b   :  { %678 = vrot.lane.b32.xlu1 %v676_v56, %s2642_s2 }
 0x98d   :  { %v679_v57 = vpop.permute.xlu1 %678 }
 0x98e   :  { %v681_v58 = vadd.f32 %v679_v57, %v215_v49 }
 0x990   :  { %2540 = vtanh.f32 %v681_v58 }
 0x99a   :  { %v2541_v59 = vpop.eup %2540 }
 0x99b   :  { %685 = vrot.lane.b32.xlu0 %v2541_v59, %s2644_s15  ;;  %v230_v59 = vadd.f32 %v2744_v5, %v2866_v14 }
 0xa0d   :  { %v686_v61 = vpop.permute.xlu0 %685 }
 0xa0e   :  { %v688_v63 = vmul.f32 %v686_v61, %v683_v60 }
 0xa10   :  { %v690_v0 = vadd.f32 %v689_v62, %v688_v63 }
 0xa12   :  { %692 = vrot.lane.b32.xlu1 %v690_v0, %s2644_s15 }
 0xa84   :  { %v693_v1 = vpop.permute.xlu1 %692 }
 0xa85   :  { %2307 = vmatmul.mubr.msk.f32.vlgmr.msra.gmra.mrb[10].mxu0 %vm390_vm5, %v693_v1 }
 0xa86   :  { %2451 = vmatpush3.bf16.msra.mxu0 %v2770_v24  ;;  %2328 = vmatprep.mubr.msk.f32.mxu0 %vm2645_vm4, %v2646_v33 }
 0xa87   :  { %2452 = vmatprep.subr.bf16.mxu0 %v2643_v26 }
 0xa8a   :  { %2454 = vmatpush3.bf16.msra.mxu0 %v2786_v29 }
 0xa8b   :  { %2461 = vmatprep.subr.bf16.mxu0 %v2643_v26 }
 0xb58   :  { %v762_v2 = vpop.f32.mrb[10].mxu0 }
 0xb59   :  { %v763_v3 = vadd.f32 %v2736_v4, %v762_v2  ;;  %v2308_v6 = vpop.f32.mrb[11].mxu0 }
 0xb5b   :  { %774 = vrot.lane.b32.xlu0 %v763_v3, %s2642_s2  ;;  %v766_v8 = vadd.f32 %v763_v3, %v220_v7 }
 0xb5d   :  { %v2134_v9 = vmul.f32 -1.442695, %v766_v8 }
 0xb5f   :  { %2542 = vpow2.f32 %v2134_v9 }
 0xb69   :  { %v2543_v10 = vpop.eup %2542 }
 0xb6a   :  { %v770_v15 = vadd.f32 1.0, %v2543_v10 }
 0xb6c   :  { %2544 = vrcp.f32 %v770_v15 }
 0xb76   :  { %v2545_v16 = vpop.eup %2544 }
 0xb77   :  { %v784_v22 = vsub.f32 1.0, %v2545_v16  ;;  %v790_v12 = vmul.f32 %v2545_v16, %v690_v0 }
 0xbcd   :  { %v775_v17 = vpop.permute.xlu0 %774 }
 0xbce   :  { %v777_v18 = vmul.f32 %v2545_v16, %v775_v17 }
 0xbd0   :  { %779 = vrot.lane.b32.xlu1 %v777_v18, %s2642_s2 }
 0xc42   :  { %v780_v19 = vpop.permute.xlu1 %779 }
 0xc43   :  { %v782_v20 = vadd.f32 %v780_v19, %v220_v7 }
 0xc45   :  { %2546 = vtanh.f32 %v782_v20  ;;  %v235_v20 = vadd.f32 %v2864_v13, %v2744_v5 }
 0xc4f   :  { %v2547_v21 = vpop.eup %2546 }
 0xc50   :  { %786 = vrot.lane.b32.xlu0 %v2547_v21, %s2644_s15 }
 0xcc2   :  { %v787_v23 = vpop.permute.xlu0 %786 }
 0xcc3   :  { %v789_v25 = vmul.f32 %v787_v23, %v784_v22 }
 0xcc5   :  { %v791_v27 = vadd.f32 %v790_v12, %v789_v25 }
 0xcc7   :  { %793 = vrot.lane.b32.xlu1 %v791_v27, %s2644_s15 }
 0xd39   :  { %v794_v28 = vpop.permute.xlu1 %793 }
 0xd3a   :  { %2318 = vmatmul.mubr.msk.f32.vlgmr.msra.gmra.mrb[10].mxu1 %vm390_vm5, %v794_v28 }
 0xd3b   :  { %2457 = vmatpush3.bf16.msra.mxu1 %v2770_v24  ;;  %2339 = vmatprep.mubr.msk.f32.mxu1 %vm2645_vm4, %v2646_v33 }
 0xd3c   :  { %2458 = vmatprep.subr.bf16.mxu1 %v2643_v26 }
 0xd3f   :  { %2460 = vmatpush3.bf16.msra.mxu1 %v2786_v29 }
 0xd40   :  { %2467 = vmatprep.subr.bf16.mxu1 %v2643_v26 }
 0xe0d   :  { %v863_v30 = vpop.f32.mrb[10].mxu1 }
 0xe0e   :  { %v864_v31 = vadd.f32 %v2736_v4, %v863_v30  ;;  %v2319_v32 = vpop.f32.mrb[11].mxu1 }
 0xe10   :  { %875 = vrot.lane.b32.xlu0 %v864_v31, %s2642_s2  ;;  %v867_v35 = vadd.f32 %v864_v31, %v225_v34 }
 0xe12   :  { %v2136_v36 = vmul.f32 -1.442695, %v867_v35 }
 0xe14   :  { %2548 = vpow2.f32 %v2136_v36 }
 0xe1e   :  { %v2549_v37 = vpop.eup %2548 }
 0xe1f   :  { %v871_v38 = vadd.f32 1.0, %v2549_v37 }
 0xe21   :  { %2550 = vrcp.f32 %v871_v38 }
 0xe2b   :  { %v2551_v45 = vpop.eup %2550 }
 0xe2c   :  { %v885_v51 = vsub.f32 1.0, %v2551_v45  ;;  %v891_v11 = vmul.f32 %v2551_v45, %v791_v27 }
 0xe82   :  { %v876_v46 = vpop.permute.xlu0 %875 }
 0xe83   :  { %v878_v47 = vmul.f32 %v2551_v45, %v876_v46 }
 0xe85   :  { %880 = vrot.lane.b32.xlu1 %v878_v47, %s2642_s2 }
 0xef7   :  { %v881_v48 = vpop.permute.xlu1 %880 }
 0xef8   :  { %v883_v49 = vadd.f32 %v881_v48, %v225_v34 }
 0xefa   :  { %2552 = vtanh.f32 %v883_v49 }
 0xf04   :  { %v2553_v50 = vpop.eup %2552 }
 0xf05   :  { %887 = vrot.lane.b32.xlu0 %v2553_v50, %s2644_s15  ;;  %v2105_v50 = vld [vmem:[%s3200_s8] ss:$0 sm:$0xff] }
 0xf77   :  { %v888_v52 = vpop.permute.xlu0 %887 }
 0xf78   :  { %v890_v53 = vmul.f32 %v888_v52, %v885_v51 }
 0xf7a   :  { %v892_v54 = vadd.f32 %v891_v11, %v890_v53 }
 0xf7c   :  { %894 = vrot.lane.b32.xlu1 %v892_v54, %s2644_s15 }
 0xfee   :  { %v895_v55 = vpop.permute.xlu1 %894 }
 0xfef   :  { %2329 = vmatmul.mubr.msk.f32.vlgmr.msra.gmra.mrb[12].mxu0 %vm390_vm5, %v895_v55 }
 0xff0   :  { %2463 = vmatpush3.bf16.msra.mxu0 %v2770_v24  ;;  %2350 = vmatprep.mubr.msk.f32.mxu0 %vm2645_vm4, %v2646_v33 }
 0xff1   :  { %2464 = vmatprep.subr.bf16.mxu0 %v2643_v26 }
 0xff4   :  { %2466 = vmatpush3.bf16.msra.mxu0 %v2786_v29 }
 0xff5   :  { %2473 = vmatprep.subr.bf16.mxu0 %v2643_v26 }
0x10c2   :  { %v964_v56 = vpop.f32.mrb[12].mxu0 }
0x10c3   :  { %v965_v57 = vadd.f32 %v2736_v4, %v964_v56  ;;  %v2330_v58 = vpop.f32.mrb[13].mxu0 }
0x10c5   :  { %976 = vrot.lane.b32.xlu0 %v965_v57, %s2642_s2  ;;  %v968_v60 = vadd.f32 %v965_v57, %v230_v59  ;;  %v2106_v57 = vld [vmem:[%s3201_s9] ss:$0 sm:$0xff] }
0x10c7   :  { %v2138_v61 = vmul.f32 -1.442695, %v968_v60 }
0x10c9   :  { %2554 = vpow2.f32 %v2138_v61 }
0x10d3   :  { %v2555_v62 = vpop.eup %2554 }
0x10d4   :  { %v972_v63 = vadd.f32 1.0, %v2555_v62 }
0x10d6   :  { %2556 = vrcp.f32 %v972_v63 }
0x10e0   :  { %v2557_v0 = vpop.eup %2556 }
0x10e1   :  { %v986_v8 = vsub.f32 1.0, %v2557_v0  ;;  %v992_v14 = vmul.f32 %v2557_v0, %v892_v54  ;;  %v2107_v54 = vld [vmem:[%s3202_s10] ss:$0 sm:$0xff] }
0x1137   :  { %v977_v1 = vpop.permute.xlu0 %976 }
0x1138   :  { %v979_v2 = vmul.f32 %v2557_v0, %v977_v1 }
0x113a   :  { %981 = vrot.lane.b32.xlu1 %v979_v2, %s2642_s2 }
0x11ac   :  { %v982_v3 = vpop.permute.xlu1 %981 }
0x11ad   :  { %v984_v6 = vadd.f32 %v982_v3, %v230_v59 }
0x11af   :  { %2558 = vtanh.f32 %v984_v6 }
0x11b9   :  { %v2559_v7 = vpop.eup %2558 }
0x11ba   :  { %988 = vrot.lane.b32.xlu0 %v2559_v7, %s2644_s15 }
0x122c   :  { %v989_v9 = vpop.permute.xlu0 %988 }
0x122d   :  { %v991_v10 = vmul.f32 %v989_v9, %v986_v8 }
0x122f   :  { %v993_v15 = vadd.f32 %v992_v14, %v991_v10  ;;  %v2648_v14 = vmov 0   ;;  %v2988_v10 = vld [vmem:[#allocation2] ss:$0 sm:$0xff] }
0x1230   :  { %2516 = vset.pattern.permute.xlu1 %v2648_v14  ;;  %2517 = vset.pattern.permute.xlu0 %v2648_v14 }
0x1231   :  { %995 = vrot.lane.b32.xlu1 %v993_v15, %s2644_s15 }
0x12a3   :  { %v996_v16 = vpop.permute.xlu1 %995 }
0x12a4   :  { %2340 = vmatmul.mubr.msk.f32.vlgmr.msra.gmra.mrb[12].mxu1 %vm390_vm5, %v996_v16 }
0x12a5   :  { %2469 = vmatpush3.bf16.msra.mxu1 %v2770_v24  ;;  %2361 = vmatprep.mubr.msk.f32.mxu1 %vm2645_vm4, %v2646_v33 }
0x12a6   :  { %2470 = vmatprep.subr.bf16.mxu1 %v2643_v26 }
0x12a9   :  { %2472 = vmatpush3.bf16.msra.mxu1 %v2786_v29 }
0x12aa   :  { %2479 = vmatprep.subr.bf16.mxu1 %v2643_v26 }
0x1377   :  { %v1065_v17 = vpop.f32.mrb[12].mxu1 }
0x1378   :  { %v1066_v18 = vadd.f32 %v2736_v4, %v1065_v17  ;;  %v2341_v19 = vpop.f32.mrb[13].mxu1 }
0x137a   :  { %1077 = vrot.lane.b32.xlu0 %v1066_v18, %s2642_s2  ;;  %v1069_v21 = vadd.f32 %v1066_v18, %v235_v20  ;;  %v2995_v18 = vld [vmem:[%s3195_s3] ss:$0 sm:$0xff] }
0x137c   :  { %v2140_v22 = vmul.f32 -1.442695, %v1069_v21 }
0x137e   :  { %2560 = vpow2.f32 %v2140_v22 }
0x1388   :  { %v2561_v23 = vpop.eup %2560 }
0x1389   :  { %v1073_v12 = vadd.f32 1.0, %v2561_v23 }
0x138b   :  { %2562 = vrcp.f32 %v1073_v12 }
0x1395   :  { %v2563_v25 = vpop.eup %2562 }
0x1396   :  { %v1087_v34 = vsub.f32 1.0, %v2563_v25  ;;  %v1093_v13 = vmul.f32 %v2563_v25, %v993_v15 }
0x13ec   :  { %v1078_v27 = vpop.permute.xlu0 %1077 }
0x13ed   :  { %v1080_v28 = vmul.f32 %v2563_v25, %v1078_v27 }
0x13ef   :  { %1082 = vrot.lane.b32.xlu1 %v1080_v28, %s2642_s2 }
0x1461   :  { %v1083_v30 = vpop.permute.xlu1 %1082 }
0x1462   :  { %v1085_v31 = vadd.f32 %v1083_v30, %v235_v20  ;;  %v334_v20 = vadd.f32 %v2744_v5, %v2810_v40 }
0x1464   :  { %2564 = vtanh.f32 %v1085_v31 }
0x146e   :  { %v2565_v32 = vpop.eup %2564 }
0x146f   :  { %1089 = vrot.lane.b32.xlu0 %v2565_v32, %s2644_s15 }
0x14e1   :  { %v1090_v35 = vpop.permute.xlu0 %1089 }
0x14e2   :  { %v1092_v36 = vmul.f32 %v1090_v35, %v1087_v34 }
0x14e4   :  { %v2949_v37 = vadd.f32 %v1093_v13, %v1092_v36 }
0x14e6   :  { %1096 = vrot.lane.b32.xlu1 %v2949_v37, %s2644_s15 }
0x1558   :  { %v1097_v38 = vpop.permute.xlu1 %1096 }
0x1559   :  { %2351 = vmatmul.mubr.msk.f32.vlgmr.msra.gmra.mrb[14].mxu0 %vm390_vm5, %v1097_v38 }
0x155a   :  { %2475 = vmatpush3.bf16.msra.mxu0 %v2770_v24  ;;  %2372 = vmatprep.mubr.msk.f32.mxu0 %vm2645_vm4, %v2646_v33 }
0x155b   :  { %2476 = vmatprep.subr.bf16.mxu0 %v2643_v26 }
0x155e   :  { %2478 = vmatpush3.bf16.msra.mxu0 %v2786_v29 }
0x155f   :  { %2485 = vmatprep.subr.bf16.mxu0 %v2643_v26 }
0x162c   :  { %v1166_v45 = vpop.f32.mrb[14].mxu0 }
0x162d   :  { %v1167_v46 = vadd.f32 %v2736_v4, %v1166_v45  ;;  %v2352_v47 = vpop.f32.mrb[15].mxu0 }
0x162f   :  { %1171 = vrot.lane.b32.xlu0 %v1167_v46, %s2647_s0 }
0x16a1   :  { %v1172_v48 = vpop.permute.xlu0 %1171 }
0x16a2   :  { %v1175_v49 = vsel %vm1174_vm6, %v1172_v48, 0.0 }
0x16a3   :  { %1176 = vadd.xlane.f32.xlu1 %v1175_v49 }
0x16b4   :  { %1193 = vrot.lane.b32.xlu1 %v2105_v50, %s2644_s15 }
0x16b8   :  { %1202 = vrot.lane.b32.xlu1 %v2107_v54, %s2644_s15 }
0x1730   :  { %v1177_v51 = vpop.xlane.xlu1 %1176 }
0x1731   :  { %v1179_v52 = vmul.f32 0.0625, %v1177_v51 }
0x1733   :  { %v1180_v11 = vsub.f32 %v1167_v46, %v1179_v52 }
0x1734   :  { %v2977_v62 = vpop.permute.xlu1 %1193 }
0x1735   :  { %v1181_v53 = vmul.f32 %v1180_v11, %v1180_v11 }
0x1737   :  { %1183 = vrot.lane.b32.xlu0 %v1181_v53, %s2647_s0 }
0x1738   :  { %v2983_v3 = vpop.permute.xlu1 %1202 }
0x17a9   :  { %v1184_v55 = vpop.permute.xlu0 %1183 }
0x17aa   :  { %v1186_v56 = vsel %vm1174_vm6, %v1184_v55, 0.0 }
0x17ab   :  { %1187 = vadd.xlane.f32.xlu0 %v1186_v56 }
0x17c1   :  { %1197 = vrot.lane.b32.xlu0 %v2106_v57, %s2644_s15 }
0x1838   :  { %v1188_v58 = vpop.xlane.xlu0 %1187 }
0x1839   :  { %v1189_v59 = vmul.f32 0.0625, %v1188_v58 }
0x183b   :  { %v1190_v60 = vadd.f32 1e-05, %v1189_v59 }
0x183c   :  { %v2979_v0 = vpop.permute.xlu0 %1197 }
0x183d   :  { %2566 = vrsqrt.f32 %v1190_v60 }
0x1847   :  { %v2567_v61 = vpop.eup %2566 }
0x1848   :  { %v1192_v63 = vmul.f32 %v2567_v61, %v1180_v11 }
0x184a   :  { %v1196_v1 = vmul.f32 %v2977_v62, %v1192_v63 }
0x184c   :  { %v1200_v2 = vadd.f32 %v2979_v0, %v1196_v1 }
0x184e   :  { %v1201_v6 = vmax.f32 %v1200_v2, 0.0 }
0x1850   :  { %v1205_v7 = vmul.f32 %v2983_v3, %v1201_v6 }
0x1852   :  { %1207 = vrot.lane.b32.xlu1 %v1205_v7, %s2647_s0 }
0x18c4   :  { %v1208_v8 = vpop.permute.xlu1 %1207 }
0x18c5   :  { %v1210_v9 = vsel %vm1174_vm6, %v1208_v8, 0.0 }
0x18c6   :  { %1211 = vadd.xlane.f32.xlu0 %v1210_v9 }
0x1953   :  { %v1212_v15 = vpop.xlane.xlu0 %1211 }
0x1954   :  { %v1213_v16 = vadd.f32 %v2988_v10, %v1212_v15 }
0x1956   :  { %v1214_v17 = vmax.f32 %v1213_v16, 0.0  ;;  %v339_v16 = vadd.f32 %v2808_v39, %v2744_v5 }
0x1958   :  { %1217 = vperm.xlu1 %2516, %v1214_v17  }
0x195c   :  { %1229 = vrot.lane.b32.xlu1 %v1167_v46, %s2642_s2 }
0x19d7   :  { %v1218_v19 = vpop.permute.xlu1 %1217 }
0x19d8   :  { %v1220_v21 = vmul.f32 %v2995_v18, %v1218_v19 }
0x19da   :  { %v1221_v22 = vadd.f32 %v1220_v21, %v334_v20 }
0x19db   :  { %v1230_v30 = vpop.permute.xlu1 %1229 }
0x19dc   :  { %v1222_v23 = vadd.f32 %v1221_v22, %v1167_v46 }
0x19de   :  { %v2142_v12 = vmul.f32 -1.442695, %v1222_v23 }
0x19e0   :  { %2568 = vpow2.f32 %v2142_v12 }
0x19ea   :  { %v2569_v25 = vpop.eup %2568 }
0x19eb   :  { %v1226_v27 = vadd.f32 1.0, %v2569_v25 }
0x19ed   :  { %2570 = vrcp.f32 %v1226_v27 }
0x19f7   :  { %v2571_v28 = vpop.eup %2570 }
0x19f8   :  { %v1232_v31 = vmul.f32 %v2571_v28, %v1230_v30  ;;  %v1239_v40 = vsub.f32 1.0, %v2571_v28  ;;  %v1245_v36 = vmul.f32 %v2571_v28, %v2949_v37 }
0x19fa   :  { %1234 = vrot.lane.b32.xlu1 %v1232_v31, %s2642_s2 }
0x1a6c   :  { %v1235_v32 = vpop.permute.xlu1 %1234 }
0x1a6d   :  { %v1237_v34 = vadd.f32 %v1235_v32, %v1221_v22 }
0x1a6f   :  { %2572 = vtanh.f32 %v1237_v34 }
0x1a79   :  { %v2573_v35 = vpop.eup %2572 }
0x1a7a   :  { %1241 = vrot.lane.b32.xlu1 %v2573_v35, %s2644_s15 }
0x1aec   :  { %v1242_v13 = vpop.permute.xlu1 %1241 }
0x1aed   :  { %v1244_v38 = vmul.f32 %v1242_v13, %v1239_v40 }
0x1aef   :  { %v3003_v45 = vadd.f32 %v1245_v36, %v1244_v38 }
0x1af1   :  { %1248 = vrot.lane.b32.xlu1 %v3003_v45, %s2644_s15 }
0x1b63   :  { %v1249_v46 = vpop.permute.xlu1 %1248 }
0x1b64   :  { %2362 = vmatmul.mubr.msk.f32.vlgmr.msra.gmra.mrb[14].mxu1 %vm390_vm5, %v1249_v46 }
0x1b65   :  { %2481 = vmatpush3.bf16.msra.mxu1 %v2770_v24  ;;  %2383 = vmatprep.mubr.msk.f32.mxu1 %vm2645_vm4, %v2646_v33 }
0x1b66   :  { %2482 = vmatprep.subr.bf16.mxu1 %v2643_v26 }
0x1b69   :  { %2484 = vmatpush3.bf16.msra.mxu1 %v2786_v29 }
0x1b6a   :  { %2491 = vmatprep.subr.bf16.mxu1 %v2643_v26 }
0x1c37   :  { %v1318_v37 = vpop.f32.mrb[14].mxu1 }
0x1c38   :  { %v1319_v47 = vadd.f32 %v2736_v4, %v1318_v37  ;;  %v2363_v48 = vpop.f32.mrb[15].mxu1 }
0x1c3a   :  { %1323 = vrot.lane.b32.xlu1 %v1319_v47, %s2647_s0 }
0x1cac   :  { %v1324_v49 = vpop.permute.xlu1 %1323 }
0x1cad   :  { %v1326_v50 = vsel %vm1174_vm6, %v1324_v49, 0.0 }
0x1cae   :  { %1327 = vadd.xlane.f32.xlu1 %v1326_v50 }
0x1d3b   :  { %v1328_v51 = vpop.xlane.xlu1 %1327 }
0x1d3c   :  { %v1329_v52 = vmul.f32 0.0625, %v1328_v51 }
0x1d3e   :  { %v1330_v11 = vsub.f32 %v1319_v47, %v1329_v52 }
0x1d40   :  { %v1331_v53 = vmul.f32 %v1330_v11, %v1330_v11 }
0x1d42   :  { %1333 = vrot.lane.b32.xlu0 %v1331_v53, %s2647_s0 }
0x1db4   :  { %v1334_v54 = vpop.permute.xlu0 %1333 }
0x1db5   :  { %v1336_v55 = vsel %vm1174_vm6, %v1334_v54, 0.0 }
0x1db6   :  { %1337 = vadd.xlane.f32.xlu0 %v1336_v55 }
0x1e43   :  { %v1338_v56 = vpop.xlane.xlu0 %1337 }
0x1e44   :  { %v1339_v57 = vmul.f32 0.0625, %v1338_v56 }
0x1e46   :  { %v1340_v58 = vadd.f32 1e-05, %v1339_v57 }
0x1e48   :  { %2574 = vrsqrt.f32 %v1340_v58 }
0x1e52   :  { %v2575_v59 = vpop.eup %2574 }
0x1e53   :  { %v1342_v60 = vmul.f32 %v2575_v59, %v1330_v11 }
0x1e55   :  { %v1343_v61 = vmul.f32 %v1342_v60, %v2977_v62 }
0x1e57   :  { %v1344_v63 = vadd.f32 %v1343_v61, %v2979_v0 }
0x1e59   :  { %v1345_v1 = vmax.f32 %v1344_v63, 0.0 }
0x1e5b   :  { %v1346_v2 = vmul.f32 %v1345_v1, %v2983_v3 }
0x1e5d   :  { %1348 = vrot.lane.b32.xlu1 %v1346_v2, %s2647_s0 }
0x1ecf   :  { %v1349_v6 = vpop.permute.xlu1 %1348 }
0x1ed0   :  { %v1351_v7 = vsel %vm1174_vm6, %v1349_v6, 0.0  ;;  %v3063_v6 = vld [vmem:[%s3197_s5] ss:$0 sm:$0xff] }
0x1ed1   :  { %1352 = vadd.xlane.f32.xlu1 %v1351_v7  ;;  %v344_v7 = vadd.f32 %v3063_v6, %v2814_v42 }
0x1ee2   :  { %1372 = vrot.lane.b32.xlu1 %v1319_v47, %s2642_s2 }
0x1f5e   :  { %v1353_v8 = vpop.xlane.xlu1 %1352 }
0x1f5f   :  { %v1354_v9 = vadd.f32 %v2988_v10, %v1353_v8 }
0x1f61   :  { %v1355_v14 = vmax.f32 %v1354_v9, 0.0 }
0x1f62   :  { %v1373_v25 = vpop.permute.xlu1 %1372 }
0x1f63   :  { %1357 = vst.msk [vmem:[#allocation3] sm:$0xff] %vm1356_vm7, %v1355_v14  ;;  %1360 = vperm.xlu0 %2517, %v1355_v14  }
0x1fe2   :  { %v1361_v15 = vpop.permute.xlu0 %1360 }
0x1fe3   :  { %v1363_v17 = vmul.f32 %v2995_v18, %v1361_v15 }
0x1fe5   :  { %v1364_v19 = vadd.f32 %v1363_v17, %v339_v16 }
0x1fe7   :  { %v1365_v20 = vadd.f32 %v1364_v19, %v1319_v47 }
0x1fe9   :  { %v2144_v21 = vmul.f32 -1.442695, %v1365_v20 }
0x1feb   :  { %2576 = vpow2.f32 %v2144_v21 }
0x1ff5   :  { %v2577_v22 = vpop.eup %2576 }
0x1ff6   :  { %v1369_v23 = vadd.f32 1.0, %v2577_v22 }
0x1ff8   :  { %2578 = vrcp.f32 %v1369_v23 }
0x2002   :  { %v2579_v12 = vpop.eup %2578 }
0x2003   :  { %v1375_v27 = vmul.f32 %v2579_v12, %v1373_v25  ;;  %v1382_v5 = vsub.f32 1.0, %v2579_v12  ;;  %v1388_v32 = vmul.f32 %v2579_v12, %v3003_v45 }
0x2005   :  { %1377 = vrot.lane.b32.xlu0 %v1375_v27, %s2642_s2 }
0x2077   :  { %v1378_v28 = vpop.permute.xlu0 %1377 }
0x2078   :  { %v1380_v30 = vadd.f32 %v1378_v28, %v1364_v19 }
0x207a   :  { %2580 = vtanh.f32 %v1380_v30 }
0x2084   :  { %v2581_v31 = vpop.eup %2580 }
0x2085   :  { %1384 = vrot.lane.b32.xlu1 %v2581_v31, %s2644_s15 }
0x20f7   :  { %v1385_v39 = vpop.permute.xlu1 %1384 }
0x20f8   :  { %v1387_v34 = vmul.f32 %v1385_v39, %v1382_v5  ;;  %v3084_v39 = vld [vmem:[%s3199_s7] ss:$0 sm:$0xff]  ;;  %s2649_s7 = smov 2  }
0x20fa   :  { %v3032_v35 = vadd.f32 %v1388_v32, %v1387_v34 }
0x20fc   :  { %1391 = vrot.lane.b32.xlu0 %v3032_v35, %s2644_s15 }
0x216e   :  { %v1392_v40 = vpop.permute.xlu0 %1391 }
0x216f   :  { %2373 = vmatmul.mubr.msk.f32.vlgmr.msra.gmra.mrb[16].mxu0 %vm390_vm5, %v1392_v40 }
0x2170   :  { %2487 = vmatpush3.bf16.msra.mxu0 %v2770_v24  ;;  %2394 = vmatprep.mubr.msk.f32.mxu0 %vm2645_vm4, %v2646_v33 }
0x2171   :  { %2488 = vmatprep.subr.bf16.mxu0 %v2643_v26 }
0x2174   :  { %2490 = vmatpush3.bf16.msra.mxu0 %v2786_v29 }
0x2175   :  { %2497 = vmatprep.subr.bf16.mxu0 %v2643_v26 }
0x2242   :  { %v1461_v13 = vpop.f32.mrb[16].mxu0 }
0x2243   :  { %v1462_v36 = vadd.f32 %v2736_v4, %v1461_v13  ;;  %v2374_v38 = vpop.f32.mrb[17].mxu0 }
0x2245   :  { %1466 = vrot.lane.b32.xlu1 %v1462_v36, %s2647_s0 }
0x22b7   :  { %v1467_v45 = vpop.permute.xlu1 %1466 }
0x22b8   :  { %v1469_v46 = vsel %vm1174_vm6, %v1467_v45, 0.0 }
0x22b9   :  { %1470 = vadd.xlane.f32.xlu0 %v1469_v46 }
0x2346   :  { %v1471_v37 = vpop.xlane.xlu0 %1470 }
0x2347   :  { %v1472_v47 = vmul.f32 0.0625, %v1471_v37 }
0x2349   :  { %v1473_v48 = vsub.f32 %v1462_v36, %v1472_v47 }
0x234b   :  { %v1474_v49 = vmul.f32 %v1473_v48, %v1473_v48 }
0x234d   :  { %1476 = vrot.lane.b32.xlu1 %v1474_v49, %s2647_s0 }
0x23bf   :  { %v1477_v50 = vpop.permute.xlu1 %1476 }
0x23c0   :  { %v1479_v51 = vsel %vm1174_vm6, %v1477_v50, 0.0 }
0x23c1   :  { %1480 = vadd.xlane.f32.xlu1 %v1479_v51 }
0x244e   :  { %v1481_v52 = vpop.xlane.xlu1 %1480 }
0x244f   :  { %v1482_v11 = vmul.f32 0.0625, %v1481_v52 }
0x2451   :  { %v1483_v4 = vadd.f32 1e-05, %v1482_v11 }
0x2453   :  { %2582 = vrsqrt.f32 %v1483_v4 }
0x245d   :  { %v2583_v53 = vpop.eup %2582 }
0x245e   :  { %v1485_v54 = vmul.f32 %v2583_v53, %v1473_v48 }
0x2460   :  { %v1486_v55 = vmul.f32 %v1485_v54, %v2977_v62 }
0x2462   :  { %v1487_v56 = vadd.f32 %v1486_v55, %v2979_v0 }
0x2464   :  { %v1488_v57 = vmax.f32 %v1487_v56, 0.0 }
0x2466   :  { %v1489_v58 = vmul.f32 %v1488_v57, %v2983_v3 }
0x2468   :  { %1491 = vrot.lane.b32.xlu0 %v1489_v58, %s2647_s0 }
0x246c   :  { %1518 = vrot.lane.b32.xlu0 %v1462_v36, %s2642_s2 }
0x24da   :  { %v1492_v59 = vpop.permute.xlu0 %1491 }
0x24db   :  { %v1494_v60 = vsel %vm1174_vm6, %v1492_v59, 0.0 }
0x24dc   :  { %1495 = vadd.xlane.f32.xlu1 %v1494_v60  ;;  %v349_v60 = vadd.f32 %v3063_v6, %v2812_v41 }
0x24de   :  { %v1519_v20 = vpop.permute.xlu0 %1518 }
0x2569   :  { %v1496_v61 = vpop.xlane.xlu1 %1495 }
0x256a   :  { %v3055_v63 = vadd.f32 %v2988_v10, %v1496_v61 }
0x256c   :  { %v1498_v1 = vmax.f32 %v3055_v63, 0.0 }
0x256e   :  { %1506 = vperm.xlu1 %2516, %v1498_v1  }
0x25ed   :  { %v1507_v2 = vpop.permute.xlu1 %1506 }
0x25ee   :  { %v1509_v8 = vmul.f32 %v2995_v18, %v1507_v2 }
0x25f0   :  { %v1510_v9 = vadd.f32 %v1509_v8, %v344_v7 }
0x25f2   :  { %v1511_v14 = vadd.f32 %v1510_v9, %v1462_v36 }
0x25f4   :  { %v2146_v15 = vmul.f32 -1.442695, %v1511_v14 }
0x25f6   :  { %2584 = vpow2.f32 %v2146_v15 }
0x2600   :  { %v2585_v16 = vpop.eup %2584 }
0x2601   :  { %v1515_v17 = vadd.f32 1.0, %v2585_v16 }
0x2603   :  { %2586 = vrcp.f32 %v1515_v17 }
0x260d   :  { %v2587_v19 = vpop.eup %2586 }
0x260e   :  { %v1521_v21 = vmul.f32 %v2587_v19, %v1519_v20  ;;  %v1528_v42 = vsub.f32 1.0, %v2587_v19  ;;  %v1534_v27 = vmul.f32 %v2587_v19, %v3032_v35 }
0x2610   :  { %1523 = vrot.lane.b32.xlu0 %v1521_v21, %s2642_s2 }
0x2682   :  { %v1524_v22 = vpop.permute.xlu0 %1523 }
0x2683   :  { %v1526_v23 = vadd.f32 %v1524_v22, %v1510_v9 }
0x2685   :  { %2588 = vtanh.f32 %v1526_v23 }
0x268f   :  { %v2589_v12 = vpop.eup %2588 }
0x2690   :  { %1530 = vrot.lane.b32.xlu0 %v2589_v12, %s2644_s15 }
0x2702   :  { %v1531_v25 = vpop.permute.xlu0 %1530 }
0x2703   :  { %v1533_v28 = vmul.f32 %v1531_v25, %v1528_v42 }
0x2705   :  { %v3071_v30 = vadd.f32 %v1534_v27, %v1533_v28 }
0x2707   :  { %1537 = vrot.lane.b32.xlu1 %v3071_v30, %s2644_s15 }
0x2779   :  { %v1538_v31 = vpop.permute.xlu1 %1537 }
0x277a   :  { %2384 = vmatmul.mubr.msk.f32.vlgmr.msra.gmra.mrb[16].mxu1 %vm390_vm5, %v1538_v31 }
0x277b   :  { %2493 = vmatpush3.bf16.msra.mxu1 %v2770_v24  ;;  %2405 = vmatprep.mubr.msk.f32.mxu1 %vm2645_vm4, %v2646_v33 }
0x277c   :  { %2494 = vmatprep.subr.bf16.mxu1 %v2643_v26 }
0x277f   :  { %2496 = vmatpush3.bf16.msra.mxu1 %v2786_v29 }
0x284d   :  { %v1607_v5 = vpop.f32.mrb[16].mxu1 }
0x284e   :  { %v1608_v32 = vadd.f32 %v3084_v39, %v1607_v5  ;;  %v2385_v34 = vpop.f32.mrb[17].mxu1 }
0x2850   :  { %1612 = vrot.lane.b32.xlu0 %v1608_v32, %s2647_s0 }
0x28c2   :  { %v1613_v35 = vpop.permute.xlu0 %1612 }
0x28c3   :  { %v1615_v40 = vsel %vm1174_vm6, %v1613_v35, 0.0 }
0x28c4   :  { %1616 = vadd.xlane.f32.xlu1 %v1615_v40 }
0x2951   :  { %v1617_v13 = vpop.xlane.xlu1 %1616 }
0x2952   :  { %v1618_v36 = vmul.f32 0.0625, %v1617_v13 }
0x2954   :  { %v1619_v38 = vsub.f32 %v1608_v32, %v1618_v36 }
0x2956   :  { %v1620_v45 = vmul.f32 %v1619_v38, %v1619_v38 }
0x2958   :  { %1622 = vrot.lane.b32.xlu0 %v1620_v45, %s2647_s0 }
0x29ca   :  { %v1623_v46 = vpop.permute.xlu0 %1622 }
0x29cb   :  { %v1625_v37 = vsel %vm1174_vm6, %v1623_v46, 0.0 }
0x29cc   :  { %1626 = vadd.xlane.f32.xlu0 %v1625_v37 }
0x2a59   :  { %v1627_v47 = vpop.xlane.xlu0 %1626 }
0x2a5a   :  { %v1628_v48 = vmul.f32 0.0625, %v1627_v47 }
0x2a5c   :  { %v1629_v49 = vadd.f32 1e-05, %v1628_v48 }
0x2a5e   :  { %2590 = vrsqrt.f32 %v1629_v49 }
0x2a68   :  { %v2591_v50 = vpop.eup %2590 }
0x2a69   :  { %v1631_v51 = vmul.f32 %v2591_v50, %v1619_v38 }
0x2a6b   :  { %v1632_v52 = vmul.f32 %v1631_v51, %v2977_v62 }
0x2a6d   :  { %v1633_v11 = vadd.f32 %v1632_v52, %v2979_v0 }
0x2a6f   :  { %v1634_v4 = vmax.f32 %v1633_v11, 0.0 }
0x2a71   :  { %v1635_v53 = vmul.f32 %v1634_v4, %v2983_v3  ;;  %v354_v4 = vadd.f32 %v3063_v6, %v2818_v44 }
0x2a73   :  { %1637 = vrot.lane.b32.xlu1 %v1635_v53, %s2647_s0 }
0x2a77   :  { %1664 = vrot.lane.b32.xlu1 %v1608_v32, %s2642_s2 }
0x2ae5   :  { %v1638_v54 = vpop.permute.xlu1 %1637 }
0x2ae6   :  { %v1640_v55 = vsel %vm1174_vm6, %v1638_v54, 0.0 }
0x2ae7   :  { %1641 = vadd.xlane.f32.xlu0 %v1640_v55 }
0x2ae9   :  { %v1665_v16 = vpop.permute.xlu1 %1664 }
0x2b74   :  { %v1642_v56 = vpop.xlane.xlu0 %1641 }
0x2b75   :  { %v3098_v57 = vadd.f32 %v2988_v10, %v1642_v56 }
0x2b77   :  { %v1644_v58 = vmax.f32 %v3098_v57, 0.0 }
0x2b79   :  { %1652 = vperm.xlu0 %2517, %v1644_v58  }
0x2bf8   :  { %v1653_v59 = vpop.permute.xlu0 %1652 }
0x2bf9   :  { %v1655_v61 = vmul.f32 %v2995_v18, %v1653_v59 }
0x2bfb   :  { %v1656_v2 = vadd.f32 %v1655_v61, %v349_v60 }
0x2bfd   :  { %v1657_v7 = vadd.f32 %v1656_v2, %v1608_v32 }
0x2bff   :  { %v2148_v8 = vmul.f32 -1.442695, %v1657_v7 }
0x2c01   :  { %2592 = vpow2.f32 %v2148_v8 }
0x2c0b   :  { %v2593_v9 = vpop.eup %2592 }
0x2c0c   :  { %v1661_v14 = vadd.f32 1.0, %v2593_v9 }
0x2c0e   :  { %2594 = vrcp.f32 %v1661_v14 }
0x2c18   :  { %v2595_v15 = vpop.eup %2594 }
0x2c19   :  { %v1667_v17 = vmul.f32 %v2595_v15, %v1665_v16  ;;  %v1674_v41 = vsub.f32 1.0, %v2595_v15  ;;  %v1680_v23 = vmul.f32 %v2595_v15, %v3071_v30 }
0x2c1b   :  { %1669 = vrot.lane.b32.xlu1 %v1667_v17, %s2642_s2 }
0x2c8d   :  { %v1670_v19 = vpop.permute.xlu1 %1669 }
0x2c8e   :  { %v1672_v20 = vadd.f32 %v1670_v19, %v1656_v2 }
0x2c90   :  { %2596 = vtanh.f32 %v1672_v20 }
0x2c9a   :  { %v2597_v21 = vpop.eup %2596 }
0x2c9b   :  { %1676 = vrot.lane.b32.xlu1 %v2597_v21, %s2644_s15 }
0x2d0d   :  { %v1677_v22 = vpop.permute.xlu1 %1676 }
0x2d0e   :  { %v1679_v12 = vmul.f32 %v1677_v22, %v1674_v41 }
0x2d10   :  { %v3109_v42 = vadd.f32 %v1680_v23, %v1679_v12 }
0x2d12   :  { %1683 = vrot.lane.b32.xlu0 %v3109_v42, %s2644_s15 }
0x2d84   :  { %v1684_v25 = vpop.permute.xlu0 %1683 }
0x2d85   :  { %2395 = vmatmul.mubr.msk.f32.vlgmr.msra.gmra.mrb[18].mxu0 %vm390_vm5, %v1684_v25 }
0x2d86   :  { %2499 = vmatpush3.bf16.msra.mxu0 %v2770_v24  ;;  %2416 = vmatprep.mubr.msk.f32.mxu0 %vm2645_vm4, %v2646_v33 }
0x2d87   :  { %2500 = vmatprep.subr.bf16.mxu0 %v2643_v26 }
0x2d8a   :  { %2502 = vmatpush3.bf16.msra.mxu0 %v2786_v29 }
0x2e58   :  { %v1753_v27 = vpop.f32.mrb[18].mxu0 }
0x2e59   :  { %v1754_v28 = vadd.f32 %v3084_v39, %v1753_v27  ;;  %v2396_v30 = vpop.f32.mrb[19].mxu0 }
0x2e5b   :  { %1758 = vrot.lane.b32.xlu1 %v1754_v28, %s2647_s0 }
0x2ecd   :  { %v1759_v31 = vpop.permute.xlu1 %1758 }
0x2ece   :  { %v1761_v5 = vsel %vm1174_vm6, %v1759_v31, 0.0 }
0x2ecf   :  { %1762 = vadd.xlane.f32.xlu0 %v1761_v5 }
0x2f5c   :  { %v1763_v32 = vpop.xlane.xlu0 %1762 }
0x2f5d   :  { %v1764_v34 = vmul.f32 0.0625, %v1763_v32 }
0x2f5f   :  { %v1765_v24 = vsub.f32 %v1754_v28, %v1764_v34 }
0x2f61   :  { %v1766_v35 = vmul.f32 %v1765_v24, %v1765_v24 }
0x2f63   :  { %1768 = vrot.lane.b32.xlu1 %v1766_v35, %s2647_s0 }
0x2fd5   :  { %v1769_v33 = vpop.permute.xlu1 %1768 }
0x2fd6   :  { %v1771_v26 = vsel %vm1174_vm6, %v1769_v33, 0.0 }
0x2fd7   :  { %1772 = vadd.xlane.f32.xlu1 %v1771_v26 }
0x3064   :  { %v1773_v29 = vpop.xlane.xlu1 %1772 }
0x3065   :  { %v1774_v40 = vmul.f32 0.0625, %v1773_v29 }
0x3067   :  { %v1775_v13 = vadd.f32 1e-05, %v1774_v40 }
0x3069   :  { %2598 = vrsqrt.f32 %v1775_v13 }
0x3073   :  { %v2599_v36 = vpop.eup %2598 }
0x3074   :  { %v1777_v38 = vmul.f32 %v2599_v36, %v1765_v24 }
0x3076   :  { %v1778_v45 = vmul.f32 %v1777_v38, %v2977_v62 }
0x3078   :  { %v1779_v46 = vadd.f32 %v1778_v45, %v2979_v0 }
0x307a   :  { %v1780_v37 = vmax.f32 %v1779_v46, 0.0 }
0x307c   :  { %v1781_v47 = vmul.f32 %v1780_v37, %v2983_v3 }
0x307e   :  { %1783 = vrot.lane.b32.xlu0 %v1781_v47, %s2647_s0  ;;  %v359_v47 = vadd.f32 %v3063_v6, %v2816_v43 }
0x3082   :  { %1810 = vrot.lane.b32.xlu0 %v1754_v28, %s2642_s2 }
0x30f0   :  { %v1784_v48 = vpop.permute.xlu0 %1783 }
0x30f1   :  { %v1786_v49 = vsel %vm1174_vm6, %v1784_v48, 0.0 }
0x30f2   :  { %1787 = vadd.xlane.f32.xlu1 %v1786_v49 }
0x30f4   :  { %v1811_v2 = vpop.permute.xlu0 %1810 }
0x317f   :  { %v1788_v50 = vpop.xlane.xlu1 %1787 }
0x3180   :  { %v3131_v51 = vadd.f32 %v2988_v10, %v1788_v50 }
0x3182   :  { %v1790_v52 = vmax.f32 %v3131_v51, 0.0 }
0x3184   :  { %1798 = vperm.xlu1 %2516, %v1790_v52  }
0x3203   :  { %v1799_v11 = vpop.permute.xlu1 %1798 }
0x3204   :  { %v1801_v53 = vmul.f32 %v2995_v18, %v1799_v11 }
0x3206   :  { %v1802_v54 = vadd.f32 %v1801_v53, %v354_v4 }
0x3208   :  { %v1803_v55 = vadd.f32 %v1802_v54, %v1754_v28 }
0x320a   :  { %v2150_v56 = vmul.f32 -1.442695, %v1803_v55 }
0x320c   :  { %2600 = vpow2.f32 %v2150_v56 }
0x3216   :  { %v2601_v59 = vpop.eup %2600 }
0x3217   :  { %v1807_v60 = vadd.f32 1.0, %v2601_v59 }
0x3219   :  { %2602 = vrcp.f32 %v1807_v60 }
0x3223   :  { %v2603_v61 = vpop.eup %2602 }
0x3224   :  { %v1813_v7 = vmul.f32 %v2603_v61, %v1811_v2  ;;  %v1820_v44 = vsub.f32 1.0, %v2603_v61  ;;  %v1826_v16 = vmul.f32 %v2603_v61, %v3109_v42 }
0x3226   :  { %1815 = vrot.lane.b32.xlu0 %v1813_v7, %s2642_s2 }
0x3298   :  { %v1816_v8 = vpop.permute.xlu0 %1815 }
0x3299   :  { %v1818_v9 = vadd.f32 %v1816_v8, %v1802_v54 }
0x329b   :  { %2604 = vtanh.f32 %v1818_v9 }
0x32a5   :  { %v2605_v14 = vpop.eup %2604 }
0x32a6   :  { %1822 = vrot.lane.b32.xlu0 %v2605_v14, %s2644_s15 }
0x3318   :  { %v1823_v15 = vpop.permute.xlu0 %1822 }
0x3319   :  { %v1825_v17 = vmul.f32 %v1823_v15, %v1820_v44 }
0x331b   :  { %v1827_v19 = vadd.f32 %v1826_v16, %v1825_v17 }
0x331d   :  { %1829 = vrot.lane.b32.xlu1 %v1827_v19, %s2644_s15 }
0x338f   :  { %v1830_v20 = vpop.permute.xlu1 %1829 }
0x3390   :  { %2406 = vmatmul.mubr.msk.f32.vlgmr.msra.gmra.mrb[18].mxu1 %vm390_vm5, %v1830_v20 }
0x3463   :  { %v1899_v21 = vpop.f32.mrb[18].mxu1 }
0x3464   :  { %v1900_v41 = vadd.f32 %v3084_v39, %v1899_v21  ;;  %v2407_v22 = vpop.f32.mrb[19].mxu1 }
0x3466   :  { %1904 = vrot.lane.b32.xlu0 %v1900_v41, %s2647_s0 }
0x34d8   :  { %v1905_v23 = vpop.permute.xlu0 %1904 }
0x34d9   :  { %v1907_v12 = vsel %vm1174_vm6, %v1905_v23, 0.0 }
0x34da   :  { %1908 = vadd.xlane.f32.xlu1 %v1907_v12 }
0x3567   :  { %v1909_v25 = vpop.xlane.xlu1 %1908 }
0x3568   :  { %v1910_v27 = vmul.f32 0.0625, %v1909_v25 }
0x356a   :  { %v1911_v42 = vsub.f32 %v1900_v41, %v1910_v27 }
0x356c   :  { %v1912_v28 = vmul.f32 %v1911_v42, %v1911_v42 }
0x356e   :  { %1914 = vrot.lane.b32.xlu0 %v1912_v28, %s2647_s0 }
0x35e0   :  { %v1915_v30 = vpop.permute.xlu0 %1914 }
0x35e1   :  { %v1917_v31 = vsel %vm1174_vm6, %v1915_v30, 0.0 }
0x35e2   :  { %1918 = vadd.xlane.f32.xlu0 %v1917_v31 }
0x366f   :  { %v1919_v5 = vpop.xlane.xlu0 %1918 }
0x3670   :  { %v1920_v32 = vmul.f32 0.0625, %v1919_v5 }
0x3672   :  { %v1921_v34 = vadd.f32 1e-05, %v1920_v32 }
0x3674   :  { %2606 = vrsqrt.f32 %v1921_v34 }
0x367e   :  { %v2607_v24 = vpop.eup %2606 }
0x367f   :  { %v1923_v35 = vmul.f32 %v2607_v24, %v1911_v42 }
0x3681   :  { %v1924_v33 = vmul.f32 %v1923_v35, %v2977_v62 }
0x3683   :  { %v1925_v26 = vadd.f32 %v1924_v33, %v2979_v0 }
0x3685   :  { %v1926_v29 = vmax.f32 %v1925_v26, 0.0 }
0x3687   :  { %v1927_v40 = vmul.f32 %v1926_v29, %v2983_v3 }
0x3689   :  { %1929 = vrot.lane.b32.xlu1 %v1927_v40, %s2647_s0 }
0x368d   :  { %1956 = vrot.lane.b32.xlu1 %v1900_v41, %s2642_s2 }
0x36fb   :  { %v1930_v13 = vpop.permute.xlu1 %1929 }
0x36fc   :  { %v1932_v36 = vsel %vm1174_vm6, %v1930_v13, 0.0 }
0x36fd   :  { %1933 = vadd.xlane.f32.xlu0 %v1932_v36 }
0x36ff   :  { %v1957_v55 = vpop.permute.xlu1 %1956 }
0x378a   :  { %v1934_v38 = vpop.xlane.xlu0 %1933 }
0x378b   :  { %v1935_v45 = vadd.f32 %v2988_v10, %v1934_v38 }
0x378d   :  { %v1936_v46 = vmax.f32 %v1935_v45, 0.0 }
0x378f   :  { %1944 = vperm.xlu0 %2517, %v1936_v46  }
0x380e   :  { %v1945_v37 = vpop.permute.xlu0 %1944 }
0x380f   :  { %v1947_v48 = vmul.f32 %v2995_v18, %v1945_v37 }
0x3811   :  { %v1948_v49 = vadd.f32 %v1947_v48, %v359_v47 }
0x3813   :  { %v1949_v50 = vadd.f32 %v1948_v49, %v1900_v41 }
0x3815   :  { %v2152_v11 = vmul.f32 -1.442695, %v1949_v50 }
0x3817   :  { %2608 = vpow2.f32 %v2152_v11 }
0x3821   :  { %v2609_v4 = vpop.eup %2608 }
0x3822   :  { %v1953_v53 = vadd.f32 1.0, %v2609_v4 }
0x3824   :  { %2610 = vrcp.f32 %v1953_v53 }
0x382e   :  { %v2611_v54 = vpop.eup %2610 }
0x382f   :  { %v1959_v56 = vmul.f32 %v2611_v54, %v1957_v55  ;;  %v1966_v43 = vsub.f32 1.0, %v2611_v54  ;;  %v1972_v6 = vmul.f32 %v2611_v54, %v1827_v19 }
0x3831   :  { %1961 = vrot.lane.b32.xlu1 %v1959_v56, %s2642_s2  ;;  %s2650_s2 = smov 3  }
0x38a3   :  { %v1962_v59 = vpop.permute.xlu1 %1961 }
0x38a4   :  { %v1964_v60 = vadd.f32 %v1962_v59, %v1948_v49 }
0x38a6   :  { %2612 = vtanh.f32 %v1964_v60 }
0x38b0   :  { %v2613_v61 = vpop.eup %2612 }
0x38b1   :  { %1968 = vrot.lane.b32.xlu1 %v2613_v61, %s2644_s15 }
0x3923   :  { %v1969_v18 = vpop.permute.xlu1 %1968 }
0x3924   :  { %v1971_v2 = vmul.f32 %v1969_v18, %v1966_v43 }
0x3926   :  { %v1973_v7 = vadd.f32 %v1972_v6, %v1971_v2 }
0x3928   :  { %1975 = vrot.lane.b32.xlu0 %v1973_v7, %s2644_s15  ;;  %s2653_s15 = smov 5  }
0x399a   :  { %v1976_v8 = vpop.permute.xlu0 %1975 }
0x399b   :  { %2417 = vmatmul.mubr.msk.f32.vlgmr.msra.gmra.mrb[20].mxu0 %vm390_vm5, %v1976_v8 }
0x3a6e   :  { %v2045_v9 = vpop.f32.mrb[20].mxu0 }
0x3a6f   :  { %v2046_v14 = vadd.f32 %v3084_v39, %v2045_v9  ;;  %v2418_v44 = vpop.f32.mrb[21].mxu0 }
0x3a71   :  { %2050 = vrot.lane.b32.xlu1 %v2046_v14, %s2647_s0 }
0x3ae3   :  { %v2051_v15 = vpop.permute.xlu1 %2050 }
0x3ae4   :  { %v2053_v16 = vsel %vm1174_vm6, %v2051_v15, 0.0 }
0x3ae5   :  { %2054 = vadd.xlane.f32.xlu0 %v2053_v16 }
0x3b72   :  { %v2055_v17 = vpop.xlane.xlu0 %2054 }
0x3b73   :  { %v2056_v20 = vmul.f32 0.0625, %v2055_v17 }
0x3b75   :  { %v2057_v19 = vsub.f32 %v2046_v14, %v2056_v20 }
0x3b77   :  { %v2058_v21 = vmul.f32 %v2057_v19, %v2057_v19 }
0x3b79   :  { %2060 = vrot.lane.b32.xlu1 %v2058_v21, %s2647_s0 }
0x3beb   :  { %v2061_v41 = vpop.permute.xlu1 %2060 }
0x3bec   :  { %v2063_v22 = vsel %vm1174_vm6, %v2061_v41, 0.0 }
0x3bed   :  { %2064 = vadd.xlane.f32.xlu1 %v2063_v22 }
0x3c7a   :  { %v2065_v23 = vpop.xlane.xlu1 %2064 }
0x3c7b   :  { %v2066_v12 = vmul.f32 0.0625, %v2065_v23 }
0x3c7d   :  { %v2067_v39 = vadd.f32 1e-05, %v2066_v12 }
0x3c7f   :  { %2614 = vrsqrt.f32 %v2067_v39 }
0x3c89   :  { %v2615_v25 = vpop.eup %2614 }
0x3c8a   :  { %v2069_v27 = vmul.f32 %v2615_v25, %v2057_v19 }
0x3c8c   :  { %v2070_v42 = vmul.f32 %v2069_v27, %v2977_v62 }
0x3c8e   :  { %v2071_v28 = vadd.f32 %v2070_v42, %v2979_v0 }
0x3c90   :  { %v2072_v30 = vmax.f32 %v2071_v28, 0.0 }
0x3c92   :  { %v2073_v31 = vmul.f32 %v2072_v30, %v2983_v3 }
0x3c94   :  { %2075 = vrot.lane.b32.xlu0 %v2073_v31, %s2647_s0 }
0x3c98   :  { %1646 = vrot.lane.b32.xlu0 %v1644_v58, %s2649_s7 }
0x3c9c   :  { %1792 = vrot.lane.b32.xlu0 %v1790_v52, %s2650_s2 }
0x3ca0   :  { %1938 = vrot.lane.b32.xlu0 %v1936_v46, %s2651_s6 }
0x3d06   :  { %v2076_v5 = vpop.permute.xlu0 %2075 }
0x3d07   :  { %v2078_v62 = vsel %vm1174_vm6, %v2076_v5, 0.0 }
0x3d08   :  { %2079 = vadd.xlane.f32.xlu1 %v2078_v62 }
0x3d0a   :  { %v1647_v0 = vpop.permute.xlu0 %1646 }
0x3d0e   :  { %v1793_v32 = vpop.permute.xlu0 %1792 }
0x3d12   :  { %v1939_v52 = vpop.permute.xlu0 %1938 }
0x3d19   :  { %1500 = vrot.lane.b32.xlu1 %v1498_v1, %s2652_s14 }
0x3d95   :  { %v2080_v3 = vpop.xlane.xlu1 %2079 }
0x3d96   :  { %v2081_v57 = vadd.f32 %v2988_v10, %v2080_v3 }
0x3d98   :  { %v2082_v58 = vmax.f32 %v2081_v57, 0.0 }
0x3d99   :  { %v1501_v51 = vpop.permute.xlu1 %1500 }
0x3d9a   :  { %1504 = vst.msk [vmem:[#allocation3] sm:$0xff] %vm1503_vm8, %v1501_v51  ;;  %2084 = vrot.lane.b32.xlu1 %v2082_v58, %s2653_s15 }
0x3d9b   :  { %1650 = vst.msk [vmem:[#allocation3] sm:$0xff] %vm1649_vm9, %v1647_v0 }
0x3d9c   :  { %1796 = vst.msk [vmem:[#allocation3] sm:$0xff] %vm1795_vm10, %v1793_v32 }
0x3d9d   :  { %1942 = vst.msk [vmem:[#allocation3] sm:$0xff] %vm1941_vm11, %v1939_v52 }
0x3e0c   :  { %v2085_v63 = vpop.permute.xlu1 %2084 }
0x3e0d   :  { %2088 = vst.msk [vmem:[#allocation3] sm:$0xff] %vm2087_vm12, %v2085_v63 }
0x3e0e   :  { %2629 = shalt.err (!%p2626_p4)
}
0x3e0f   :  { %s2630_s20 = scalar_lea.hbm %s3204_s12, 128 }
0x3e10   :  { %p2631_p5 = scmp.ne.s32.totalorder %s3204_s12, %s2630_s20  ;;  %p2634_p6 = scmp.lt.u32.totalorder %s2630_s20, %s3204_s12 }
0x3e12   :  { %p2636_p7 = pnand %p2634_p6, %p2631_p5 }
0x3e14   :  { %2639 = shalt.err (!%p2636_p7)
}
0x3e15   :  { %2098 = dma.vmem_to_hbm [thread:$0]  %s2096_s16, 128, %s3204_s12, [#allocation4]  }
0x3e16   :  { %2640 = dma.done.wait [#allocation4], 128  }
0x3e17   :  { %2641 = vsyncadd [#allocation4], 4294967168 }
0x3e18   :  { %2102 = vsyncpa [#allocation4], 1 }

</bundles_post_ra>
